<compile_context>
chip_gen: v7x
topology: tpu7x:2x2x1
jax: 0.10.0
libtpu: 0.0.40
codegen_flags: <defaults>
</compile_context>

<pallas_src>
import functools

import jax
import jax.numpy as jnp
import numpy as np
from jax.experimental import pallas as pl
from jax.experimental.pallas import tpu as pltpu


# --------------------------------------------------------------------------
# Fused kernel: conv1/2/3 (+ReLU) via im2col, flatten, fc1 (+ReLU), fc2.
# Activation rows are position-major: row = l*bblk + b, cols = channels.
# --------------------------------------------------------------------------
def _fused_kernel(x_ref, w1_ref, b1_ref, w2_ref, b2_ref, w3_ref, b3_ref,
                  wf1_ref, bf1_ref, wf2_ref, bf2_ref, o_ref,
                  h1_ref, p2_ref, h2_ref, p3_ref, h3_ref, hf_ref,
                  *, bblk, K, L2, L3, C1, C2, C3, dot_dtype):
    f32 = jnp.float32

    # ---- conv1 + ReLU: patches were im2col'd in the wrapper (matmul-ready) ----
    h1_ref[...] = jnp.maximum(
        jnp.dot(x_ref[0], w1_ref[...], preferred_element_type=f32)
        + b1_ref[...], 0.0)                                    # (L1*bblk, C1) f32

    # ---- conv2: K aligned slab copies build the im2col patch, one MXU matmul ----
    for k in range(K):                                         # K=5, slab copies only
        p2_ref[:, k * C1:(k + 1) * C1] = \
            h1_ref[k * bblk:(k + L2) * bblk, :].astype(dot_dtype)
    h2_ref[...] = jnp.maximum(
        jnp.dot(p2_ref[...], w2_ref[...], preferred_element_type=f32)
        + b2_ref[...], 0.0)                                    # (L2*bblk, C2) f32

    # ---- conv3 ----
    for k in range(K):
        p3_ref[:, k * C2:(k + 1) * C2] = \
            h2_ref[k * bblk:(k + L3) * bblk, :].astype(dot_dtype)
    h3_ref[...] = jnp.maximum(
        jnp.dot(p3_ref[...], w3_ref[...], preferred_element_type=f32)
        + b3_ref[...], 0.0)                                    # (L3*bblk, C3) f32

    # ---- flatten: hf[b, l*C3 + c] = h3[l*bblk + b, c] (contiguous row blocks) ----
    for l in range(L3):
        hf_ref[:, l * C3:(l + 1) * C3] = \
            h3_ref[l * bblk:(l + 1) * bblk, :].astype(dot_dtype)

    # ---- fc1 + ReLU on the MXU: (bblk, L3*C3) @ (L3*C3, H) ----
    z = jnp.maximum(
        jnp.dot(hf_ref[...], wf1_ref[...], preferred_element_type=f32)
        + bf1_ref[...], 0.0)                                   # (bblk, H) f32

    # ---- fc2 (single output column): wf2 @ z^T -> lane-dense (1, bblk) row ----
    o_ref[...] = jax.lax.dot_general(
        wf2_ref[...], z, (((1,), (1,)), ((), ())),
        preferred_element_type=f32) + bf2_ref[...]


# --------------------------------------------------------------------------
# Wrapper: wrapper-side layout plumbing (free XLA ops) + single pallas_call
# --------------------------------------------------------------------------
def cnn_gmem_forward(x, params, *, block_b=None, dot_dtype=jnp.bfloat16):
    w1, b1, w2, b2, w3, b3, wf1, bf1, wf2, bf2 = params
    f32 = jnp.float32

    B, Cin, L = x.shape
    C1, K = w1.shape[0], w1.shape[2]
    C2 = w2.shape[0]
    C3 = w3.shape[0]
    L1 = L - (K - 1)
    L2 = L1 - (K - 1)
    L3 = L2 - (K - 1)
    F = C3 * L3                     # flatten width from conv output (not 32*Cin)
    H = wf1.shape[0]
    assert wf1.shape[1] == F, (
        f"fc1 expects {wf1.shape[1]} features but conv stack produces {F}")

    # ---- batch tiling ----
    # block_b = 128 keeps the per-step scratch (~9 MB f32+bf16) under v5e's 16 MiB
    # default scoped VMEM. On v6e push to 256-512 (raise vmem_limit_bytes); on v7x
    # large batches naturally give >=2 "parallel" tiles for the 2 TensorCores.
    Bpad8 = -(-B // 8) * 8                      # multiple of 8 -> aligned sublane tiles
    if block_b is None:
        block_b = 128
    if Bpad8 <= block_b:
        block_b = Bpad8                         # single full-batch tile
    else:
        block_b = -(-block_b // 128) * 128      # lane-dense (1, block_b) output blocks
    num_tiles = -(-Bpad8 // block_b)
    Bpad = num_tiles * block_b

    # ---- layout plumbing (outside the kernel: free XLA ops) ----
    # Position-major input + conv1 im2col + per-tile packing:
    #   patches[i, l*block_b + b, k*Cin + c] = x[i*block_b + b, c, l + k]
    x_lbc = jnp.transpose(x, (2, 0, 1)).astype(f32)                  # (L, B, Cin)
    if Bpad != B:
        x_lbc = jnp.pad(x_lbc, ((0, 0), (0, Bpad - B), (0, 0)))
    patches = jnp.concatenate([x_lbc[k:k + L1] for k in range(K)], axis=-1)
    patches = patches.reshape(L1, num_tiles, block_b, K * Cin)
    patches = jnp.transpose(patches, (1, 0, 2, 3))
    patches = patches.reshape(num_tiles, L1 * block_b, K * Cin).astype(dot_dtype)

    def conv_w(w):  # (Cout, Cin, K) -> (K*Cin, Cout), row index = k*Cin + ci
        co, ci, kk = w.shape
        return jnp.transpose(w, (2, 1, 0)).reshape(kk * ci, co).astype(dot_dtype)

    w1r, w2r, w3r = conv_w(w1), conv_w(w2), conv_w(w3)
    b1r = b1.reshape(1, C1).astype(f32)
    b2r = b2.reshape(1, C2).astype(f32)
    b3r = b3.reshape(1, C3).astype(f32)
    # PyTorch flatten index is c*L3 + l; kernel flattens as l*C3 + c -> permute wf1.
    wf1r = (jnp.transpose(wf1.reshape(H, C3, L3), (2, 1, 0))
            .reshape(L3 * C3, H).astype(dot_dtype))                  # row = l*C3 + c
    bf1r = bf1.reshape(1, H).astype(f32)
    wf2r = wf2.reshape(1, H).astype(f32)
    bf2r = bf2.reshape(1, 1).astype(f32)

    kernel = functools.partial(
        _fused_kernel, bblk=block_b, K=K, L2=L2, L3=L3,
        C1=C1, C2=C2, C3=C3, dot_dtype=dot_dtype)

    def full(arr):
        nd = arr.ndim
        return pl.BlockSpec(arr.shape, lambda i, _nd=nd: (0,) * _nd)

    out = pl.pallas_call(
        kernel,
        out_shape=jax.ShapeDtypeStruct((1, Bpad), f32),
        grid_spec=pltpu.PrefetchScalarGridSpec(
            num_scalar_prefetch=0,
            grid=(num_tiles,),
            in_specs=[
                pl.BlockSpec((1, L1 * block_b, K * Cin), lambda i: (i, 0, 0)),
                full(w1r), full(b1r),
                full(w2r), full(b2r),
                full(w3r), full(b3r),
                full(wf1r), full(bf1r),
                full(wf2r), full(bf2r),
            ],
            out_specs=pl.BlockSpec((1, block_b), lambda i: (0, i)),
            scratch_shapes=[
                pltpu.VMEM((L1 * block_b, C1), f32),             # h1 (post-ReLU)
                pltpu.VMEM((L2 * block_b, K * C1), dot_dtype),   # im2col conv2
                pltpu.VMEM((L2 * block_b, C2), f32),             # h2 (post-ReLU)
                pltpu.VMEM((L3 * block_b, K * C2), dot_dtype),   # im2col conv3
                pltpu.VMEM((L3 * block_b, C3), f32),             # h3 (post-ReLU)
                pltpu.VMEM((block_b, L3 * C3), dot_dtype),       # flattened fc1 input
            ],
        ),
        compiler_params=pltpu.CompilerParams(
            dimension_semantics=("parallel",)),
    )(patches, w1r, b1r, w2r, b2r, w3r, b3r, wf1r, bf1r, wf2r, bf2r)

    return out[0, :B][:, None]                                    # (B, 1)


# --------------------------------------------------------------------------
# Pure-JAX reference for validation
# --------------------------------------------------------------------------
def reference_forward(x, params):
    w1, b1, w2, b2, w3, b3, wf1, bf1, wf2, bf2 = params

    def conv_relu(h, w, b):
        y = jax.lax.conv_general_dilated(
            h, w, window_strides=(1,), padding='VALID',
            dimension_numbers=('NCH', 'OIH', 'NCH'))
        return jax.nn.relu(y + b[None, :, None])

    h = conv_relu(x, w1, b1)
    h = conv_relu(h, w2, b2)
    h = conv_relu(h, w3, b3)
    h = h.reshape(h.shape[0], -1)
    h = jax.nn.relu(h @ wf1.T + bf1)
    return h @ wf2.T + bf2


if __name__ == "__main__":
    # input_size (channels) = 8, L = input_size + 12 = 20 so the PyTorch flatten
    # width 32*input_size equals 32*L3 (the module's implicit contract).
    B, input_size, L = 2, 8, 20
    K = 5
    f1_input = 32 * input_size

    key = jax.random.PRNGKey(0)
    ks = jax.random.split(key, 11)

    def init(k, shape, scale):
        return (scale * jax.random.normal(k, shape)).astype(jnp.float32)

    w1 = init(ks[0], (32, input_size, K), 0.2)
    b1 = init(ks[1], (32,), 0.05)
    w2 = init(ks[2], (64, 32, K), 0.1)
    b2 = init(ks[3], (64,), 0.05)
    w3 = init(ks[4], (32, 64, K), 0.1)
    b3 = init(ks[5], (32,), 0.05)
    wf1 = init(ks[6], (256, f1_input), 0.05)
    bf1 = init(ks[7], (256,), 0.05)
    wf2 = init(ks[8], (1, 256), 0.05)
    bf2 = init(ks[9], (1,), 0.05)
    params = (w1, b1, w2, b2, w3, b3, wf1, bf1, wf2, bf2)

    x = jax.random.normal(ks[10], (B, input_size, L), jnp.float32)

    ref = jax.block_until_ready(reference_forward(x, params))

    # f32-MXU path: bit-faithful to the reference (tight tolerance).
    out_f32 = jax.block_until_ready(
        cnn_gmem_forward(x, params, dot_dtype=jnp.float32))
    assert out_f32.shape == (B, 1), out_f32.shape
    np.testing.assert_allclose(np.asarray(out_f32), np.asarray(ref),
                               rtol=1e-4, atol=1e-4)

    # Default bf16-MXU path (per perf review): looser tolerance vs f32 reference.
    out_bf16 = jax.block_until_ready(cnn_gmem_forward(x, params))
    assert out_bf16.shape == (B, 1), out_bf16.shape
    np.testing.assert_allclose(np.asarray(out_bf16), np.asarray(ref),
                               rtol=5e-2, atol=5e-2)

    print("KERNEL_OK")
</pallas_src>

<mosaic_0001>
module attributes {stable_mosaic.version = 11 : i64} {
  func.func @_fused_kernel(%arg0: i32, %arg1: memref<1x128x40xf32, #tpu.memory_space<vmem>>, %arg2: memref<40x32xf32, #tpu.memory_space<vmem>>, %arg3: memref<1x32xf32, #tpu.memory_space<vmem>>, %arg4: memref<160x64xf32, #tpu.memory_space<vmem>>, %arg5: memref<1x64xf32, #tpu.memory_space<vmem>>, %arg6: memref<320x32xf32, #tpu.memory_space<vmem>>, %arg7: memref<1x32xf32, #tpu.memory_space<vmem>>, %arg8: memref<256x256xf32, #tpu.memory_space<vmem>>, %arg9: memref<1x256xf32, #tpu.memory_space<vmem>>, %arg10: memref<1x256xf32, #tpu.memory_space<vmem>>, %arg11: memref<1x1xf32, #tpu.memory_space<vmem>>, %arg12: memref<1x8xf32, #tpu.memory_space<vmem>>, %arg13: memref<128x32xf32, #tpu.memory_space<vmem>>, %arg14: memref<96x160xf32, #tpu.memory_space<vmem>>, %arg15: memref<96x64xf32, #tpu.memory_space<vmem>>, %arg16: memref<64x320xf32, #tpu.memory_space<vmem>>, %arg17: memref<64x32xf32, #tpu.memory_space<vmem>>, %arg18: memref<8x256xf32, #tpu.memory_space<vmem>>) attributes {dimension_semantics = [#tpu.dimension_semantics<parallel>], iteration_bounds = array<i64: 1>, scalar_prefetch = 0 : i64, scratch_operands = 6 : i64, tpu.core_type = #tpu.core_type<tc>, window_params = [{transform_indices = @transform_0, window_bounds = array<i64: 1, 128, 40>}, {pipeline_mode = #tpu.pipeline_mode<synchronous>, transform_indices = @transform_1, window_bounds = array<i64: 40, 32>}, {pipeline_mode = #tpu.pipeline_mode<synchronous>, transform_indices = @transform_2, window_bounds = array<i64: 1, 32>}, {pipeline_mode = #tpu.pipeline_mode<synchronous>, transform_indices = @transform_3, window_bounds = array<i64: 160, 64>}, {pipeline_mode = #tpu.pipeline_mode<synchronous>, transform_indices = @transform_4, window_bounds = array<i64: 1, 64>}, {pipeline_mode = #tpu.pipeline_mode<synchronous>, transform_indices = @transform_5, window_bounds = array<i64: 320, 32>}, {pipeline_mode = #tpu.pipeline_mode<synchronous>, transform_indices = @transform_6, window_bounds = array<i64: 1, 32>}, {pipeline_mode = #tpu.pipeline_mode<synchronous>, transform_indices = @transform_7, window_bounds = array<i64: 256, 256>}, {pipeline_mode = #tpu.pipeline_mode<synchronous>, transform_indices = @transform_8, window_bounds = array<i64: 1, 256>}, {pipeline_mode = #tpu.pipeline_mode<synchronous>, transform_indices = @transform_9, window_bounds = array<i64: 1, 256>}, {pipeline_mode = #tpu.pipeline_mode<synchronous>, transform_indices = @transform_10, window_bounds = array<i64: 1, 1>}, {transform_indices = @transform_11, window_bounds = array<i64: 1, 8>}]} {
    %c0 = arith.constant 0 : index
    %c0_0 = arith.constant 0 : index
    %c0_1 = arith.constant 0 : index
    %0 = vector.load %arg1[%c0, %c0_0, %c0_1] : memref<1x128x40xf32, #tpu.memory_space<vmem>>, vector<1x128x40xf32>
    %1 = vector.shape_cast %0 : vector<1x128x40xf32> to vector<128x40xf32>
    %c0_2 = arith.constant 0 : index
    %c0_3 = arith.constant 0 : index
    %2 = vector.load %arg2[%c0_2, %c0_3] : memref<40x32xf32, #tpu.memory_space<vmem>>, vector<40x32xf32>
    %cst = arith.constant dense<0.000000e+00> : vector<128x32xf32>
    %3 = tpu.matmul %1, %2, %cst {dimension_numbers = #tpu.dot_dimension_numbers<[1], [0], [0], [1], [0, 0, 1, 1], [], []>} : vector<128x40xf32>, vector<40x32xf32>, vector<128x32xf32> -> vector<128x32xf32>
    %c0_4 = arith.constant 0 : index
    %c0_5 = arith.constant 0 : index
    %4 = vector.load %arg3[%c0_4, %c0_5] : memref<1x32xf32, #tpu.memory_space<vmem>>, vector<1x32xf32>
    %5 = vector.broadcast %4 : vector<1x32xf32> to vector<128x32xf32>
    %6 = arith.addf %3, %5 : vector<128x32xf32>
    %cst_6 = arith.constant 0.000000e+00 : f32
    %7 = vector.broadcast %cst_6 : f32 to vector<128x32xf32>
    %8 = arith.maximumf %6, %7 : vector<128x32xf32>
    %c0_7 = arith.constant 0 : index
    %c0_8 = arith.constant 0 : index
    %9 = vector.load %arg13[%c0_7, %c0_8] : memref<128x32xf32, #tpu.memory_space<vmem>>, vector<128x32xf32>
    tpu.vector_store %arg13[%c0_7, %c0_8], %8 {strides = array<i32>} : memref<128x32xf32, #tpu.memory_space<vmem>>, vector<128x32xf32>,
    %c0_9 = arith.constant 0 : index
    %c0_10 = arith.constant 0 : index
    %10 = vector.load %arg13[%c0_9, %c0_10] : memref<128x32xf32, #tpu.memory_space<vmem>>, vector<96x32xf32>
    %c0_11 = arith.constant 0 : index
    %c0_12 = arith.constant 0 : index
    %11 = vector.load %arg14[%c0_11, %c0_12] : memref<96x160xf32, #tpu.memory_space<vmem>>, vector<96x32xf32>
    tpu.vector_store %arg14[%c0_11, %c0_12], %10 {strides = array<i32>} : memref<96x160xf32, #tpu.memory_space<vmem>>, vector<96x32xf32>,
    %c8 = arith.constant 8 : index
    %c0_13 = arith.constant 0 : index
    %12 = vector.load %arg13[%c8, %c0_13] : memref<128x32xf32, #tpu.memory_space<vmem>>, vector<96x32xf32>
    %c0_14 = arith.constant 0 : index
    %c32 = arith.constant 32 : index
    %13 = vector.load %arg14[%c0_14, %c32] : memref<96x160xf32, #tpu.memory_space<vmem>>, vector<96x32xf32>
    tpu.vector_store %arg14[%c0_14, %c32], %12 {strides = array<i32>} : memref<96x160xf32, #tpu.memory_space<vmem>>, vector<96x32xf32>,
    %c16 = arith.constant 16 : index
    %c0_15 = arith.constant 0 : index
    %14 = vector.load %arg13[%c16, %c0_15] : memref<128x32xf32, #tpu.memory_space<vmem>>, vector<96x32xf32>
    %c0_16 = arith.constant 0 : index
    %c64 = arith.constant 64 : index
    %15 = vector.load %arg14[%c0_16, %c64] : memref<96x160xf32, #tpu.memory_space<vmem>>, vector<96x32xf32>
    tpu.vector_store %arg14[%c0_16, %c64], %14 {strides = array<i32>} : memref<96x160xf32, #tpu.memory_space<vmem>>, vector<96x32xf32>,
    %c24 = arith.constant 24 : index
    %c0_17 = arith.constant 0 : index
    %16 = vector.load %arg13[%c24, %c0_17] : memref<128x32xf32, #tpu.memory_space<vmem>>, vector<96x32xf32>
    %c0_18 = arith.constant 0 : index
    %c96 = arith.constant 96 : index
    %17 = vector.load %arg14[%c0_18, %c96] : memref<96x160xf32, #tpu.memory_space<vmem>>, vector<96x32xf32>
    tpu.vector_store %arg14[%c0_18, %c96], %16 {strides = array<i32>} : memref<96x160xf32, #tpu.memory_space<vmem>>, vector<96x32xf32>,
    %c32_19 = arith.constant 32 : index
    %c0_20 = arith.constant 0 : index
    %18 = vector.load %arg13[%c32_19, %c0_20] : memref<128x32xf32, #tpu.memory_space<vmem>>, vector<96x32xf32>
    %c0_21 = arith.constant 0 : index
    %c128 = arith.constant 128 : index
    %19 = vector.load %arg14[%c0_21, %c128] : memref<96x160xf32, #tpu.memory_space<vmem>>, vector<96x32xf32>
    tpu.vector_store %arg14[%c0_21, %c128], %18 {strides = array<i32>} : memref<96x160xf32, #tpu.memory_space<vmem>>, vector<96x32xf32>,
    %c0_22 = arith.constant 0 : index
    %c0_23 = arith.constant 0 : index
    %20 = vector.load %arg14[%c0_22, %c0_23] : memref<96x160xf32, #tpu.memory_space<vmem>>, vector<96x160xf32>
    %c0_24 = arith.constant 0 : index
    %c0_25 = arith.constant 0 : index
    %21 = vector.load %arg4[%c0_24, %c0_25] : memref<160x64xf32, #tpu.memory_space<vmem>>, vector<160x64xf32>
    %cst_26 = arith.constant dense<0.000000e+00> : vector<96x64xf32>
    %22 = tpu.matmul %20, %21, %cst_26 {dimension_numbers = #tpu.dot_dimension_numbers<[1], [0], [0], [1], [0, 0, 1, 1], [], []>} : vector<96x160xf32>, vector<160x64xf32>, vector<96x64xf32> -> vector<96x64xf32>
    %c0_27 = arith.constant 0 : index
    %c0_28 = arith.constant 0 : index
    %23 = vector.load %arg5[%c0_27, %c0_28] : memref<1x64xf32, #tpu.memory_space<vmem>>, vector<1x64xf32>
    %24 = vector.broadcast %23 : vector<1x64xf32> to vector<96x64xf32>
    %25 = arith.addf %22, %24 : vector<96x64xf32>
    %cst_29 = arith.constant 0.000000e+00 : f32
    %26 = vector.broadcast %cst_29 : f32 to vector<96x64xf32>
    %27 = arith.maximumf %25, %26 : vector<96x64xf32>
    %c0_30 = arith.constant 0 : index
    %c0_31 = arith.constant 0 : index
    %28 = vector.load %arg15[%c0_30, %c0_31] : memref<96x64xf32, #tpu.memory_space<vmem>>, vector<96x64xf32>
    tpu.vector_store %arg15[%c0_30, %c0_31], %27 {strides = array<i32>} : memref<96x64xf32, #tpu.memory_space<vmem>>, vector<96x64xf32>,
    %c0_32 = arith.constant 0 : index
    %c0_33 = arith.constant 0 : index
    %29 = vector.load %arg15[%c0_32, %c0_33] : memref<96x64xf32, #tpu.memory_space<vmem>>, vector<64x64xf32>
    %c0_34 = arith.constant 0 : index
    %c0_35 = arith.constant 0 : index
    %30 = vector.load %arg16[%c0_34, %c0_35] : memref<64x320xf32, #tpu.memory_space<vmem>>, vector<64x64xf32>
    tpu.vector_store %arg16[%c0_34, %c0_35], %29 {strides = array<i32>} : memref<64x320xf32, #tpu.memory_space<vmem>>, vector<64x64xf32>,
    %c8_36 = arith.constant 8 : index
    %c0_37 = arith.constant 0 : index
    %31 = vector.load %arg15[%c8_36, %c0_37] : memref<96x64xf32, #tpu.memory_space<vmem>>, vector<64x64xf32>
    %c0_38 = arith.constant 0 : index
    %c64_39 = arith.constant 64 : index
    %32 = vector.load %arg16[%c0_38, %c64_39] : memref<64x320xf32, #tpu.memory_space<vmem>>, vector<64x64xf32>
    tpu.vector_store %arg16[%c0_38, %c64_39], %31 {strides = array<i32>} : memref<64x320xf32, #tpu.memory_space<vmem>>, vector<64x64xf32>,
    %c16_40 = arith.constant 16 : index
    %c0_41 = arith.constant 0 : index
    %33 = vector.load %arg15[%c16_40, %c0_41] : memref<96x64xf32, #tpu.memory_space<vmem>>, vector<64x64xf32>
    %c0_42 = arith.constant 0 : index
    %c128_43 = arith.constant 128 : index
    %34 = vector.load %arg16[%c0_42, %c128_43] : memref<64x320xf32, #tpu.memory_space<vmem>>, vector<64x64xf32>
    tpu.vector_store %arg16[%c0_42, %c128_43], %33 {strides = array<i32>} : memref<64x320xf32, #tpu.memory_space<vmem>>, vector<64x64xf32>,
    %c24_44 = arith.constant 24 : index
    %c0_45 = arith.constant 0 : index
    %35 = vector.load %arg15[%c24_44, %c0_45] : memref<96x64xf32, #tpu.memory_space<vmem>>, vector<64x64xf32>
    %c0_46 = arith.constant 0 : index
    %c192 = arith.constant 192 : index
    %36 = vector.load %arg16[%c0_46, %c192] : memref<64x320xf32, #tpu.memory_space<vmem>>, vector<64x64xf32>
    tpu.vector_store %arg16[%c0_46, %c192], %35 {strides = array<i32>} : memref<64x320xf32, #tpu.memory_space<vmem>>, vector<64x64xf32>,
    %c32_47 = arith.constant 32 : index
    %c0_48 = arith.constant 0 : index
    %37 = vector.load %arg15[%c32_47, %c0_48] : memref<96x64xf32, #tpu.memory_space<vmem>>, vector<64x64xf32>
    %c0_49 = arith.constant 0 : index
    %c256 = arith.constant 256 : index
    %38 = vector.load %arg16[%c0_49, %c256] : memref<64x320xf32, #tpu.memory_space<vmem>>, vector<64x64xf32>
    tpu.vector_store %arg16[%c0_49, %c256], %37 {strides = array<i32>} : memref<64x320xf32, #tpu.memory_space<vmem>>, vector<64x64xf32>,
    %c0_50 = arith.constant 0 : index
    %c0_51 = arith.constant 0 : index
    %39 = vector.load %arg16[%c0_50, %c0_51] : memref<64x320xf32, #tpu.memory_space<vmem>>, vector<64x320xf32>
    %c0_52 = arith.constant 0 : index
    %c0_53 = arith.constant 0 : index
    %40 = vector.load %arg6[%c0_52, %c0_53] : memref<320x32xf32, #tpu.memory_space<vmem>>, vector<320x32xf32>
    %cst_54 = arith.constant dense<0.000000e+00> : vector<64x32xf32>
    %41 = tpu.matmul %39, %40, %cst_54 {dimension_numbers = #tpu.dot_dimension_numbers<[1], [0], [0], [1], [0, 0, 1, 1], [], []>} : vector<64x320xf32>, vector<320x32xf32>, vector<64x32xf32> -> vector<64x32xf32>
    %c0_55 = arith.constant 0 : index
    %c0_56 = arith.constant 0 : index
    %42 = vector.load %arg7[%c0_55, %c0_56] : memref<1x32xf32, #tpu.memory_space<vmem>>, vector<1x32xf32>
    %43 = vector.broadcast %42 : vector<1x32xf32> to vector<64x32xf32>
    %44 = arith.addf %41, %43 : vector<64x32xf32>
    %cst_57 = arith.constant 0.000000e+00 : f32
    %45 = vector.broadcast %cst_57 : f32 to vector<64x32xf32>
    %46 = arith.maximumf %44, %45 : vector<64x32xf32>
    %c0_58 = arith.constant 0 : index
    %c0_59 = arith.constant 0 : index
    %47 = vector.load %arg17[%c0_58, %c0_59] : memref<64x32xf32, #tpu.memory_space<vmem>>, vector<64x32xf32>
    tpu.vector_store %arg17[%c0_58, %c0_59], %46 {strides = array<i32>} : memref<64x32xf32, #tpu.memory_space<vmem>>, vector<64x32xf32>,
    %c0_60 = arith.constant 0 : index
    %c0_61 = arith.constant 0 : index
    %48 = vector.load %arg17[%c0_60, %c0_61] : memref<64x32xf32, #tpu.memory_space<vmem>>, vector<8x32xf32>
    %c0_62 = arith.constant 0 : index
    %c0_63 = arith.constant 0 : index
    %49 = vector.load %arg18[%c0_62, %c0_63] : memref<8x256xf32, #tpu.memory_space<vmem>>, vector<8x32xf32>
    tpu.vector_store %arg18[%c0_62, %c0_63], %48 {strides = array<i32>} : memref<8x256xf32, #tpu.memory_space<vmem>>, vector<8x32xf32>,
    %c8_64 = arith.constant 8 : index
    %c0_65 = arith.constant 0 : index
    %50 = vector.load %arg17[%c8_64, %c0_65] : memref<64x32xf32, #tpu.memory_space<vmem>>, vector<8x32xf32>
    %c0_66 = arith.constant 0 : index
    %c32_67 = arith.constant 32 : index
    %51 = vector.load %arg18[%c0_66, %c32_67] : memref<8x256xf32, #tpu.memory_space<vmem>>, vector<8x32xf32>
    tpu.vector_store %arg18[%c0_66, %c32_67], %50 {strides = array<i32>} : memref<8x256xf32, #tpu.memory_space<vmem>>, vector<8x32xf32>,
    %c16_68 = arith.constant 16 : index
    %c0_69 = arith.constant 0 : index
    %52 = vector.load %arg17[%c16_68, %c0_69] : memref<64x32xf32, #tpu.memory_space<vmem>>, vector<8x32xf32>
    %c0_70 = arith.constant 0 : index
    %c64_71 = arith.constant 64 : index
    %53 = vector.load %arg18[%c0_70, %c64_71] : memref<8x256xf32, #tpu.memory_space<vmem>>, vector<8x32xf32>
    tpu.vector_store %arg18[%c0_70, %c64_71], %52 {strides = array<i32>} : memref<8x256xf32, #tpu.memory_space<vmem>>, vector<8x32xf32>,
    %c24_72 = arith.constant 24 : index
    %c0_73 = arith.constant 0 : index
    %54 = vector.load %arg17[%c24_72, %c0_73] : memref<64x32xf32, #tpu.memory_space<vmem>>, vector<8x32xf32>
    %c0_74 = arith.constant 0 : index
    %c96_75 = arith.constant 96 : index
    %55 = vector.load %arg18[%c0_74, %c96_75] : memref<8x256xf32, #tpu.memory_space<vmem>>, vector<8x32xf32>
    tpu.vector_store %arg18[%c0_74, %c96_75], %54 {strides = array<i32>} : memref<8x256xf32, #tpu.memory_space<vmem>>, vector<8x32xf32>,
    %c32_76 = arith.constant 32 : index
    %c0_77 = arith.constant 0 : index
    %56 = vector.load %arg17[%c32_76, %c0_77] : memref<64x32xf32, #tpu.memory_space<vmem>>, vector<8x32xf32>
    %c0_78 = arith.constant 0 : index
    %c128_79 = arith.constant 128 : index
    %57 = vector.load %arg18[%c0_78, %c128_79] : memref<8x256xf32, #tpu.memory_space<vmem>>, vector<8x32xf32>
    tpu.vector_store %arg18[%c0_78, %c128_79], %56 {strides = array<i32>} : memref<8x256xf32, #tpu.memory_space<vmem>>, vector<8x32xf32>,
    %c40 = arith.constant 40 : index
    %c0_80 = arith.constant 0 : index
    %58 = vector.load %arg17[%c40, %c0_80] : memref<64x32xf32, #tpu.memory_space<vmem>>, vector<8x32xf32>
    %c0_81 = arith.constant 0 : index
    %c160 = arith.constant 160 : index
    %59 = vector.load %arg18[%c0_81, %c160] : memref<8x256xf32, #tpu.memory_space<vmem>>, vector<8x32xf32>
    tpu.vector_store %arg18[%c0_81, %c160], %58 {strides = array<i32>} : memref<8x256xf32, #tpu.memory_space<vmem>>, vector<8x32xf32>,
    %c48 = arith.constant 48 : index
    %c0_82 = arith.constant 0 : index
    %60 = vector.load %arg17[%c48, %c0_82] : memref<64x32xf32, #tpu.memory_space<vmem>>, vector<8x32xf32>
    %c0_83 = arith.constant 0 : index
    %c192_84 = arith.constant 192 : index
    %61 = vector.load %arg18[%c0_83, %c192_84] : memref<8x256xf32, #tpu.memory_space<vmem>>, vector<8x32xf32>
    tpu.vector_store %arg18[%c0_83, %c192_84], %60 {strides = array<i32>} : memref<8x256xf32, #tpu.memory_space<vmem>>, vector<8x32xf32>,
    %c56 = arith.constant 56 : index
    %c0_85 = arith.constant 0 : index
    %62 = vector.load %arg17[%c56, %c0_85] : memref<64x32xf32, #tpu.memory_space<vmem>>, vector<8x32xf32>
    %c0_86 = arith.constant 0 : index
    %c224 = arith.constant 224 : index
    %63 = vector.load %arg18[%c0_86, %c224] : memref<8x256xf32, #tpu.memory_space<vmem>>, vector<8x32xf32>
    tpu.vector_store %arg18[%c0_86, %c224], %62 {strides = array<i32>} : memref<8x256xf32, #tpu.memory_space<vmem>>, vector<8x32xf32>,
    %c0_87 = arith.constant 0 : index
    %c0_88 = arith.constant 0 : index
    %64 = vector.load %arg18[%c0_87, %c0_88] : memref<8x256xf32, #tpu.memory_space<vmem>>, vector<8x256xf32>
    %c0_89 = arith.constant 0 : index
    %c0_90 = arith.constant 0 : index
    %65 = vector.load %arg8[%c0_89, %c0_90] : memref<256x256xf32, #tpu.memory_space<vmem>>, vector<256x256xf32>
    %cst_91 = arith.constant dense<0.000000e+00> : vector<8x256xf32>
    %66 = tpu.matmul %64, %65, %cst_91 {dimension_numbers = #tpu.dot_dimension_numbers<[1], [0], [0], [1], [0, 0, 1, 1], [], []>} : vector<8x256xf32>, vector<256x256xf32>, vector<8x256xf32> -> vector<8x256xf32>
    %c0_92 = arith.constant 0 : index
    %c0_93 = arith.constant 0 : index
    %67 = vector.load %arg9[%c0_92, %c0_93] : memref<1x256xf32, #tpu.memory_space<vmem>>, vector<1x256xf32>
    %68 = vector.broadcast %67 : vector<1x256xf32> to vector<8x256xf32>
    %69 = arith.addf %66, %68 : vector<8x256xf32>
    %cst_94 = arith.constant 0.000000e+00 : f32
    %70 = vector.broadcast %cst_94 : f32 to vector<8x256xf32>
    %71 = arith.maximumf %69, %70 : vector<8x256xf32>
    %c0_95 = arith.constant 0 : index
    %c0_96 = arith.constant 0 : index
    %72 = vector.load %arg10[%c0_95, %c0_96] : memref<1x256xf32, #tpu.memory_space<vmem>>, vector<1x256xf32>
    %cst_97 = arith.constant dense<0.000000e+00> : vector<1x8xf32>
    %73 = tpu.matmul %72, %71, %cst_97 {dimension_numbers = #tpu.dot_dimension_numbers<[1], [1], [0], [0], [0, 0, 1, 0], [], []>} : vector<1x256xf32>, vector<8x256xf32>, vector<1x8xf32> -> vector<1x8xf32>
    %c0_98 = arith.constant 0 : index
    %c0_99 = arith.constant 0 : index
    %74 = vector.load %arg11[%c0_98, %c0_99] : memref<1x1xf32, #tpu.memory_space<vmem>>, vector<1x1xf32>
    %75 = vector.broadcast %74 : vector<1x1xf32> to vector<1x8xf32>
    %76 = arith.addf %73, %75 : vector<1x8xf32>
    %c0_100 = arith.constant 0 : index
    %c0_101 = arith.constant 0 : index
    %77 = vector.load %arg12[%c0_100, %c0_101] : memref<1x8xf32, #tpu.memory_space<vmem>>, vector<1x8xf32>
    tpu.vector_store %arg12[%c0_100, %c0_101], %76 {strides = array<i32>} : memref<1x8xf32, #tpu.memory_space<vmem>>, vector<1x8xf32>,
    return
  }
  func.func @transform_0(%arg0: i32) -> (i32, i32, i32) {
    %c0_i32 = arith.constant 0 : i32
    %c0_i32_0 = arith.constant 0 : i32
    %c0_i32_1 = arith.constant 0 : i32
    return %arg0, %c0_i32, %c0_i32_0 : i32, i32, i32
  }
  func.func @transform_1(%arg0: i32) -> (i32, i32) {
    %c0_i32 = arith.constant 0 : i32
    %c0_i32_0 = arith.constant 0 : i32
    %c0_i32_1 = arith.constant 0 : i32
    return %c0_i32, %c0_i32_0 : i32, i32
  }
  func.func @transform_2(%arg0: i32) -> (i32, i32) {
    %c0_i32 = arith.constant 0 : i32
    %c0_i32_0 = arith.constant 0 : i32
    %c0_i32_1 = arith.constant 0 : i32
    return %c0_i32, %c0_i32_0 : i32, i32
  }
  func.func @transform_3(%arg0: i32) -> (i32, i32) {
    %c0_i32 = arith.constant 0 : i32
    %c0_i32_0 = arith.constant 0 : i32
    %c0_i32_1 = arith.constant 0 : i32
    return %c0_i32, %c0_i32_0 : i32, i32
  }
  func.func @transform_4(%arg0: i32) -> (i32, i32) {
    %c0_i32 = arith.constant 0 : i32
    %c0_i32_0 = arith.constant 0 : i32
    %c0_i32_1 = arith.constant 0 : i32
    return %c0_i32, %c0_i32_0 : i32, i32
  }
  func.func @transform_5(%arg0: i32) -> (i32, i32) {
    %c0_i32 = arith.constant 0 : i32
    %c0_i32_0 = arith.constant 0 : i32
    %c0_i32_1 = arith.constant 0 : i32
    return %c0_i32, %c0_i32_0 : i32, i32
  }
  func.func @transform_6(%arg0: i32) -> (i32, i32) {
    %c0_i32 = arith.constant 0 : i32
    %c0_i32_0 = arith.constant 0 : i32
    %c0_i32_1 = arith.constant 0 : i32
    return %c0_i32, %c0_i32_0 : i32, i32
  }
  func.func @transform_7(%arg0: i32) -> (i32, i32) {
    %c0_i32 = arith.constant 0 : i32
    %c0_i32_0 = arith.constant 0 : i32
    %c0_i32_1 = arith.constant 0 : i32
    return %c0_i32, %c0_i32_0 : i32, i32
  }
  func.func @transform_8(%arg0: i32) -> (i32, i32) {
    %c0_i32 = arith.constant 0 : i32
    %c0_i32_0 = arith.constant 0 : i32
    %c0_i32_1 = arith.constant 0 : i32
    return %c0_i32, %c0_i32_0 : i32, i32
  }
  func.func @transform_9(%arg0: i32) -> (i32, i32) {
    %c0_i32 = arith.constant 0 : i32
    %c0_i32_0 = arith.constant 0 : i32
    %c0_i32_1 = arith.constant 0 : i32
    return %c0_i32, %c0_i32_0 : i32, i32
  }
  func.func @transform_10(%arg0: i32) -> (i32, i32) {
    %c0_i32 = arith.constant 0 : i32
    %c0_i32_0 = arith.constant 0 : i32
    %c0_i32_1 = arith.constant 0 : i32
    return %c0_i32, %c0_i32_0 : i32, i32
  }
  func.func @transform_11(%arg0: i32) -> (i32, i32) {
    %c0_i32 = arith.constant 0 : i32
    %c0_i32_0 = arith.constant 0 : i32
    return %c0_i32, %arg0 : i32, i32
  }
}

</mosaic_0001>

<bundles_post_ra>
// kernel: tpu_custom_call.1
= control target key start
LH: loop header
LB: loop body
LE: loop exit
PB: predicated region body
PF: predicated region fallthrough
CT: control target
= control target key end

     0   :  { %s2751_s0 = inlined_call_operand.vmem [shape: f32[1,128,40], index: 0, kind: input, shape index: {}]   ;;  %s2752_s1 = inlined_call_operand.vmem [shape: f32[40,32], index: 1, kind: input, shape index: {}]   ;;  %s2753_s2 = inlined_call_operand.vmem [shape: f32[1,32], index: 2, kind: input, shape index: {}]   ;;  %s2754_s3 = inlined_call_operand.vmem [shape: f32[160,64], index: 3, kind: input, shape index: {}]   ;;  %s2755_s4 = inlined_call_operand.vmem [shape: f32[1,64], index: 4, kind: input, shape index: {}]   ;;  %s2756_s5 = inlined_call_operand.vmem [shape: f32[320,32], index: 5, kind: input, shape index: {}]   ;;  %s2757_s6 = inlined_call_operand.vmem [shape: f32[1,32], index: 6, kind: input, shape index: {}]   ;;  %s2758_s7 = inlined_call_operand.vmem [shape: f32[256,256], index: 7, kind: input, shape index: {}]   ;;  %s2759_s8 = inlined_call_operand.vmem [shape: f32[1,256], index: 8, kind: input, shape index: {}]   ;;  %s2760_s9 = inlined_call_operand.vmem [shape: f32[1,256], index: 9, kind: input, shape index: {}]   ;;  %s2761_s10 = inlined_call_operand.<no memory space> [shape: f32[1,1], index: 10, kind: input, shape index: {}]   ;;  %s2762_s11 = inlined_call_operand.hbm [shape: f32[1,8], index: 11, kind: output, shape index: {}]  }
   0x1   :  { %v16_v0 = vstv %s2761_s10 }
   0x2   :  { %17 = vst [vmem:[#allocation8] sm:$0x1] %v16_v0 }
   0x3   :  { %v57_v1 = vld [vmem:[%s2752_s1] sm:$0xff]  ;;  %v58_v2 = vld [vmem:[%s2752_s1 + $0x8] sm:$0xff]  ;;  %v59_v3 = vld [vmem:[%s2752_s1 + $0x10] sm:$0xff]  ;;  %vm69_vm0 = vcmask 326656  }
   0x4   :  { %v1759_v4 = vpack.c.bf16 %v58_v2, %v57_v1  ;;  %v60_v5 = vld [vmem:[%s2752_s1 + $0x18] sm:$0xff]  ;;  %v41_v6 = vld [vmem:[%s2751_s0] sm:$0xff] }
   0x5   :  { %v1763_v7 = vpack.c.bf16 %v60_v5, %v59_v3  ;;  %1707 = vmatprep.mubr.msk.f32.mxu0 %vm69_vm0, %v41_v6  ;;  %v61_v8 = vld [vmem:[%s2752_s1 + $0x20] sm:$0xff] }
   0x6   :  { %1760 = vmatprep.subr.bf16.mxu0 %v1759_v4 }
   0x7   :  { %1762 = vmatpush3.bf16.msra.mxu0 %v1759_v4 }
   0x8   :  { %1764 = vmatprep.subr.bf16.mxu0 %v1763_v7 }
   0x9   :  { %18 = vsyncpa [#allocation10], 0  ;;  %v42_v9 = vld [vmem:[%s2751_s0 + $0x8] sm:$0xff]  ;;  %v43_v10 = vld [vmem:[%s2751_s0 + $0x10] sm:$0xff]  ;;  %v1940_v27 = vmov 0.0|0.0   ;;  %vm279_vm1 = vcmask 261120  }
   0xa   :  { %v44_v11 = vld [vmem:[%s2751_s0 + $0x18] sm:$0xff]  ;;  %v45_v12 = vld [vmem:[%s2751_s0 + $0x20] sm:$0xff]  ;;  %v46_v13 = vld [vmem:[%s2751_s0 + $0x28] sm:$0xff]  ;;  %1767 = vmatprep.subr.bf16.mxu1 %v1940_v27  ;;  %s1941_s13 = smov 32   ;;  %s1942_s17 = smov 96   ;;  %vm380_vm2 = vcmask 523520  }
   0xb   :  { %1766 = vmatpush3.bf16.msra.mxu0 %v1763_v7  ;;  %v47_v14 = vld [vmem:[%s2751_s0 + $0x30] sm:$0xff]  ;;  %v48_v15 = vld [vmem:[%s2751_s0 + $0x38] sm:$0xff]  ;;  %v49_v16 = vld [vmem:[%s2751_s0 + $0x40] sm:$0xff]  ;;  %s1943_s18 = smov 64   ;;  %vm453_vm3 = vcmask 785920   ;;  %vm526_vm4 = vcmask 1048320  }
   0xc   :  { %1705 = vmatprep.subr.mxu0 %v61_v8  ;;  %v50_v17 = vld [vmem:[%s2751_s0 + $0x48] sm:$0xff]  ;;  %v51_v18 = vld [vmem:[%s2751_s0 + $0x50] sm:$0xff]  ;;  %v52_v19 = vld [vmem:[%s2751_s0 + $0x58] sm:$0xff]  ;;  %vm787_vm5 = vcmask 523264   ;;  %vm856_vm6 = vcmask 1048064   ;;  %vm1549_vm7 = vcmask 57344  }
   0xd   :  { %v53_v20 = vld [vmem:[%s2751_s0 + $0x60] sm:$0xff]  ;;  %v54_v21 = vld [vmem:[%s2751_s0 + $0x68] sm:$0xff]  ;;  %v55_v22 = vld [vmem:[%s2751_s0 + $0x70] sm:$0xff] }
   0xe   :  { %v56_v23 = vld [vmem:[%s2751_s0 + $0x78] sm:$0xff]  ;;  %v587_v24 = vld [vmem:[%s2754_s3] sm:$0xff]  ;;  %v588_v25 = vld [vmem:[%s2754_s3 + $0x8] sm:$0xff] }
   0xf   :  { %1706 = vmatpush3.msra.mxu0 %v61_v8  ;;  %v589_v26 = vld [vmem:[%s2754_s3 + $0x10] sm:$0xff]  ;;  %v1768_v28 = vpack.c.bf16 %v588_v25, %v587_v24  ;;  %v590_v29 = vld [vmem:[%s2754_s3 + $0x18] sm:$0xff]  ;;  %v591_v31 = vld [vmem:[%s2754_s3 + $0x20] sm:$0xff] }
  0x10   :  { %1708 = vmatmul.mubr.msk.f32.vlgmr.msra.gmra.mrb[0].mxu0 %vm69_vm0, %v42_v9  ;;  %v1771_v30 = vpack.c.bf16 %v590_v29, %v589_v26  ;;  %v592_v32 = vld [vmem:[%s2754_s3 + $0x28] sm:$0xff]  ;;  %v593_v34 = vld [vmem:[%s2754_s3 + $0x30] sm:$0xff]  ;;  %v594_v35 = vld [vmem:[%s2754_s3 + $0x38] sm:$0xff] }
  0x11   :  { %1710 = vmatprep.mubr.msk.f32.mxu0 %vm69_vm0, %v43_v10  ;;  %1769 = vmatpush1.bf16.msra.mxu1 %v1768_v28  ;;  %v1774_v33 = vpack.c.bf16 %v592_v32, %v591_v31  ;;  %v1777_v36 = vpack.c.bf16 %v594_v35, %v593_v34  ;;  %v595_v37 = vld [vmem:[%s2754_s3 + $0x40] sm:$0xff]  ;;  %v596_v38 = vld [vmem:[%s2754_s3 + $0x48] sm:$0xff]  ;;  %v597_v41 = vld [vmem:[%s2754_s3 + $0x50] sm:$0xff] }
  0x12   :  { %1770 = vmatprep.subr.bf16.mxu1 %v1940_v27  ;;  %v1780_v39 = vpack.c.bf16 %v596_v38, %v595_v37  ;;  %v2127_v40 = vld [vmem:[%s2753_s2] ss:$0 sm:$0xff]  ;;  %v598_v42 = vld [vmem:[%s2754_s3 + $0x58] sm:$0xff]  ;;  %v600_v50 = vld [vmem:[%s2754_s3 + $0x68] sm:$0xff] }
  0x13   :  { %v1783_v44 = vpack.c.bf16 %v598_v42, %v597_v41  ;;  %v599_v49 = vld [vmem:[%s2754_s3 + $0x60] sm:$0xff]  ;;  %v601_v58 = vld [vmem:[%s2754_s3 + $0x70] sm:$0xff]  ;;  %v602_v59 = vld [vmem:[%s2754_s3 + $0x78] sm:$0xff] }
  0x14   :  { %1711 = vmatmul.mubr.msk.f32.gmra.mrb[2].mxu0 %vm69_vm0, %v44_v11  ;;  %v1786_v53 = vpack.c.bf16 %v600_v50, %v599_v49  ;;  %v1789_v62 = vpack.c.bf16 %v602_v59, %v601_v58  ;;  %v603_v3 = vld [vmem:[%s2754_s3 + $0x80] sm:$0xff]  ;;  %v604_v4 = vld [vmem:[%s2754_s3 + $0x88] sm:$0xff] }
  0x15   :  { %1713 = vmatprep.mubr.msk.f32.mxu0 %vm69_vm0, %v45_v12  ;;  %1772 = vmatpush1.bf16.msra.mxu1 %v1771_v30  ;;  %v1792_v8 = vpack.c.bf16 %v604_v4, %v603_v3 }
  0x16   :  { %1773 = vmatprep.subr.bf16.mxu1 %v1940_v27 }
  0x18   :  { %1714 = vmatmul.mubr.msk.f32.gmra.mrb[4].mxu0 %vm69_vm0, %v46_v13 }
  0x19   :  { %1716 = vmatprep.mubr.msk.f32.mxu0 %vm69_vm0, %v47_v14  ;;  %1775 = vmatpush1.bf16.msra.mxu1 %v1774_v33  ;;  %v605_v14 = vld [vmem:[%s2754_s3 + $0x90] sm:$0xff] }
  0x1a   :  { %1776 = vmatprep.subr.bf16.mxu1 %v1940_v27 }
  0x1c   :  { %1717 = vmatmul.mubr.msk.f32.gmra.mrb[6].mxu0 %vm69_vm0, %v48_v15  ;;  %v606_v15 = vld [vmem:[%s2754_s3 + $0x98] sm:$0xff] }
  0x1d   :  { %1719 = vmatprep.mubr.msk.f32.mxu0 %vm69_vm0, %v49_v16  ;;  %1778 = vmatpush1.bf16.msra.mxu1 %v1777_v36 }
  0x1e   :  { %1779 = vmatprep.subr.bf16.mxu1 %v1940_v27 }
  0x20   :  { %1720 = vmatmul.mubr.msk.f32.gmra.mrb[8].mxu0 %vm69_vm0, %v50_v17 }
  0x21   :  { %1722 = vmatprep.mubr.msk.f32.mxu0 %vm69_vm0, %v51_v18  ;;  %1781 = vmatpush1.bf16.msra.mxu1 %v1780_v39 }
  0x22   :  { %1782 = vmatprep.subr.bf16.mxu1 %v1940_v27 }
  0x24   :  { %1723 = vmatmul.mubr.msk.f32.gmra.mrb[10].mxu0 %vm69_vm0, %v52_v19  ;;  %v1795_v19 = vpack.c.bf16 %v606_v15, %v605_v14 }
  0x25   :  { %1725 = vmatprep.mubr.msk.f32.mxu0 %vm69_vm0, %v53_v20  ;;  %1784 = vmatpush1.bf16.msra.mxu1 %v1783_v44 }
  0x26   :  { %1785 = vmatprep.subr.bf16.mxu1 %v1940_v27 }
  0x28   :  { %1726 = vmatmul.mubr.msk.f32.gmra.mrb[12].mxu0 %vm69_vm0, %v54_v21 }
  0x29   :  { %1728 = vmatprep.mubr.msk.f32.mxu0 %vm69_vm0, %v55_v22  ;;  %1787 = vmatpush1.bf16.msra.mxu1 %v1786_v53 }
  0x2a   :  { %1788 = vmatprep.subr.bf16.mxu1 %v1940_v27 }
  0x2c   :  { %1729 = vmatmul.mubr.msk.f32.gmra.mrb[14].mxu0 %vm69_vm0, %v56_v23 }
  0x2d   :  { %1790 = vmatpush1.bf16.msra.mxu1 %v1789_v62 }
  0x2e   :  { %1791 = vmatprep.subr.bf16.mxu1 %v1940_v27 }
  0x31   :  { %1793 = vmatpush1.bf16.msra.mxu1 %v1792_v8 }
  0x32   :  { %1794 = vmatprep.subr.bf16.mxu1 %v1940_v27 }
  0x35   :  { %1796 = vmatpush1.bf16.msra.mxu1 %v1795_v19 }
  0xe3   :  { %v1709_v43 = vpop.f32.mrb[0].mxu0 }
  0xe4   :  { %v190_v45 = vadd.f32 %v1709_v43, %v2127_v40  ;;  %v184_v46 = vpop.f32.mrb[1].mxu0 }
  0xe5   :  { %v185_v47 = vadd.f32 %v2127_v40, %v184_v46 }
  0xe6   :  { %v264_v48 = vmax.f32 %v190_v45, 0.0 }
  0xe7   :  { %v263_v51 = vmax.f32 %v185_v47, 0.0  ;;  %v1712_v52 = vpop.f32.mrb[2].mxu0 }
  0xe8   :  { %281 = vst.msk [vmem:[#allocation2 + $0x8] sm:$0xff] %vm279_vm1, %v264_v48  ;;  %v200_v54 = vadd.f32 %v1712_v52, %v2127_v40  ;;  %v194_v55 = vpop.f32.mrb[3].mxu0 }
  0xe9   :  { %280 = vst.msk [vmem:[#allocation2] sm:$0xff] %vm279_vm1, %v263_v51  ;;  %v195_v56 = vadd.f32 %v2127_v40, %v194_v55 }
  0xea   :  { %v266_v57 = vmax.f32 %v200_v54, 0.0 }
  0xeb   :  { %v265_v60 = vmax.f32 %v195_v56, 0.0  ;;  %v1715_v61 = vpop.f32.mrb[4].mxu0 }
  0xec   :  { %283 = vst.msk [vmem:[#allocation2 + $0x18] sm:$0xff] %vm279_vm1, %v266_v57  ;;  %v210_v63 = vadd.f32 %v1715_v61, %v2127_v40  ;;  %v204_v0 = vpop.f32.mrb[5].mxu0 }
  0xed   :  { %282 = vst.msk [vmem:[#allocation2 + $0x10] sm:$0xff] %vm279_vm1, %v265_v60  ;;  %v205_v1 = vadd.f32 %v2127_v40, %v204_v0 }
  0xee   :  { %v268_v2 = vmax.f32 %v210_v63, 0.0 }
  0xef   :  { %v267_v5 = vmax.f32 %v205_v1, 0.0  ;;  %v320_v6 = vld [vmem:[#allocation2 + $0x8] sm:$0xff]  ;;  %v1718_v7 = vpop.f32.mrb[6].mxu0 }
  0xf0   :  { %285 = vst.msk [vmem:[#allocation2 + $0x28] sm:$0xff] %vm279_vm1, %v268_v2  ;;  %344 = vrot.lane.b32.xlu0 %v320_v6, %s1941_s13  ;;  %v220_v9 = vadd.f32 %v1718_v7, %v2127_v40  ;;  %v214_v10 = vpop.f32.mrb[7].mxu0  ;;  %v296_v11 = vld [vmem:[#allocation2] sm:$0xff]  ;;  %309 = vst.msk [vmem:[#allocation3 + $0x10] sm:$0xff] %vm279_vm1, %v320_v6 }
  0xf1   :  { %284 = vst.msk [vmem:[#allocation2 + $0x20] sm:$0xff] %vm279_vm1, %v267_v5  ;;  %v215_v12 = vadd.f32 %v2127_v40, %v214_v10  ;;  %308 = vst.msk [vmem:[#allocation3] sm:$0xff] %vm279_vm1, %v296_v11 }
  0xf2   :  { %v270_v13 = vmax.f32 %v220_v9, 0.0 }
  0xf3   :  { %v466_v16 = vld [vmem:[#allocation2 + $0x18] sm:$0xff]  ;;  %v269_v17 = vmax.f32 %v215_v12, 0.0  ;;  %v1721_v18 = vpop.f32.mrb[8].mxu0 }
  0xf4   :  { %490 = vrot.lane.b32.xlu1 %v466_v16, %s1942_s17  ;;  %419 = vrot.lane.b32.xlu0 %v466_v16, %s1943_s18  ;;  %v321_v20 = vld [vmem:[#allocation2 + $0x10] sm:$0xff]  ;;  %287 = vst.msk [vmem:[#allocation2 + $0x38] sm:$0xff] %vm279_vm1, %v270_v13  ;;  %v230_v21 = vadd.f32 %v1721_v18, %v2127_v40  ;;  %v224_v22 = vpop.f32.mrb[9].mxu0  ;;  %311 = vst.msk [vmem:[#allocation3 + $0x30] sm:$0xff] %vm279_vm1, %v466_v16 }
  0xf5   :  { %286 = vst.msk [vmem:[#allocation2 + $0x30] sm:$0xff] %vm279_vm1, %v269_v17  ;;  %v225_v23 = vadd.f32 %v2127_v40, %v224_v22  ;;  %310 = vst.msk [vmem:[#allocation3 + $0x20] sm:$0xff] %vm279_vm1, %v321_v20 }
  0xf6   :  { %v272_v24 = vmax.f32 %v230_v21, 0.0 }
  0xf7   :  { %v540_v25 = vld [vmem:[#allocation2 + $0x28] sm:$0xff]  ;;  %v271_v26 = vmax.f32 %v225_v23, 0.0  ;;  %v1724_v27 = vpop.f32.mrb[10].mxu0 }
  0xf8   :  { %552 = vst.msk [vmem:[#allocation3 + $0x18] sm:$0xff] %vm279_vm1, %v540_v25  ;;  %348 = vrot.lane.b32.xlu0 %v466_v16, %s1941_s13  ;;  %346 = vrot.lane.b32.xlu1 %v321_v20, %s1941_s13  ;;  %v467_v28 = vld [vmem:[#allocation2 + $0x20] sm:$0xff]  ;;  %289 = vst.msk [vmem:[#allocation2 + $0x48] sm:$0xff] %vm279_vm1, %v272_v24  ;;  %v240_v29 = vadd.f32 %v1724_v27, %v2127_v40  ;;  %v234_v30 = vpop.f32.mrb[11].mxu0 }
  0xf9   :  { %313 = vst.msk [vmem:[#allocation3 + $0x50] sm:$0xff] %vm279_vm1, %v540_v25  ;;  %551 = vst.msk [vmem:[#allocation3 + $0x8] sm:$0xff] %vm279_vm1, %v467_v28  ;;  %v235_v31 = vadd.f32 %v2127_v40, %v234_v30 }
  0xfa   :  { %288 = vst.msk [vmem:[#allocation2 + $0x40] sm:$0xff] %vm279_vm1, %v271_v26  ;;  %312 = vst.msk [vmem:[#allocation3 + $0x40] sm:$0xff] %vm279_vm1, %v467_v28  ;;  %v274_v32 = vmax.f32 %v240_v29, 0.0 }
  0xfb   :  { %v542_v33 = vld [vmem:[#allocation2 + $0x38] sm:$0xff]  ;;  %v273_v34 = vmax.f32 %v235_v31, 0.0  ;;  %v1727_v35 = vpop.f32.mrb[12].mxu0 }
  0xfc   :  { %554 = vst.msk [vmem:[#allocation3 + $0x38] sm:$0xff] %vm279_vm1, %v542_v33  ;;  %v541_v36 = vld [vmem:[#allocation2 + $0x30] sm:$0xff]  ;;  %417 = vrot.lane.b32.xlu0 %v321_v20, %s1943_s18  ;;  %492 = vrot.lane.b32.xlu1 %v467_v28, %s1942_s17  ;;  %291 = vst.msk [vmem:[#allocation2 + $0x58] sm:$0xff] %vm279_vm1, %v274_v32  ;;  %v250_v37 = vadd.f32 %v1727_v35, %v2127_v40  ;;  %v244_v38 = vpop.f32.mrb[13].mxu0 }
  0xfd   :  { %315 = vst.msk [vmem:[#allocation3 + $0x70] sm:$0xff] %vm279_vm1, %v542_v33  ;;  %553 = vst.msk [vmem:[#allocation3 + $0x28] sm:$0xff] %vm279_vm1, %v541_v36  ;;  %v245_v39 = vadd.f32 %v2127_v40, %v244_v38 }
  0xfe   :  { %290 = vst.msk [vmem:[#allocation2 + $0x50] sm:$0xff] %vm279_vm1, %v273_v34  ;;  %314 = vst.msk [vmem:[#allocation3 + $0x60] sm:$0xff] %vm279_vm1, %v541_v36  ;;  %v276_v41 = vmax.f32 %v250_v37, 0.0 }
  0xff   :  { %v544_v42 = vld [vmem:[#allocation2 + $0x48] sm:$0xff]  ;;  %v275_v43 = vmax.f32 %v245_v39, 0.0  ;;  %v1730_v50 = vpop.f32.mrb[14].mxu0  ;;  %v566_v5 = vld [vmem:[#allocation3 + $0x18] sm:$0xff] }
 0x100   :  { %494 = vrot.lane.b32.xlu0 %v540_v25, %s1942_s17  ;;  %421 = vrot.lane.b32.xlu1 %v467_v28, %s1943_s18  ;;  %v564_v44 = vld [vmem:[#allocation3 + $0x8] sm:$0xff]  ;;  %556 = vst.msk [vmem:[#allocation3 + $0x58] sm:$0xff] %vm279_vm1, %v544_v42  ;;  %293 = vst.msk [vmem:[#allocation2 + $0x68] sm:$0xff] %vm279_vm1, %v276_v41  ;;  %v260_v51 = vadd.f32 %v1730_v50, %v2127_v40  ;;  %v254_v52 = vpop.f32.mrb[15].mxu0 }
 0x101   :  { %v543_v45 = vld [vmem:[#allocation2 + $0x40] sm:$0xff]  ;;  %317 = vst.msk [vmem:[#allocation3 + $0x90] sm:$0xff] %vm279_vm1, %v544_v42  ;;  %1583 = vmatprep.mubr.msk.f32.mxu1 %vm279_vm1, %v564_v44  ;;  %292 = vst.msk [vmem:[#allocation2 + $0x60] sm:$0xff] %vm279_vm1, %v275_v43  ;;  %v255_v53 = vadd.f32 %v2127_v40, %v254_v52 }
 0x102   :  { %555 = vst.msk [vmem:[#allocation3 + $0x48] sm:$0xff] %vm279_vm1, %v543_v45  ;;  %316 = vst.msk [vmem:[#allocation3 + $0x80] sm:$0xff] %vm279_vm1, %v543_v45  ;;  %v278_v54 = vmax.f32 %v260_v51, 0.0 }
 0x103   :  { %v546_v46 = vld [vmem:[#allocation2 + $0x58] sm:$0xff]  ;;  %v277_v55 = vmax.f32 %v255_v53, 0.0  ;;  %v985_v53 = vld [vmem:[%s2756_s5 + $0x80] sm:$0xff] }
 0x104   :  { %423 = vrot.lane.b32.xlu0 %v540_v25, %s1943_s18  ;;  %350 = vrot.lane.b32.xlu1 %v467_v28, %s1941_s13  ;;  %558 = vst.msk [vmem:[#allocation3 + $0x78] sm:$0xff] %vm279_vm1, %v546_v46  ;;  %319 = vst.msk [vmem:[#allocation3 + $0xb0] sm:$0xff] %vm279_vm1, %v546_v46  ;;  %v568_v9 = vld [vmem:[#allocation3 + $0x28] sm:$0xff]  ;;  %v570_v13 = vld [vmem:[#allocation3 + $0x38] sm:$0xff] }
 0x105   :  { %v545_v47 = vld [vmem:[#allocation2 + $0x50] sm:$0xff]  ;;  %295 = vst.msk [vmem:[#allocation2 + $0x78] sm:$0xff] %vm279_vm1, %v278_v54  ;;  %294 = vst.msk [vmem:[#allocation2 + $0x70] sm:$0xff] %vm279_vm1, %v277_v55  ;;  %v986_v54 = vld [vmem:[%s2756_s5 + $0x88] sm:$0xff] }
 0x106   :  { %557 = vst.msk [vmem:[#allocation3 + $0x68] sm:$0xff] %vm279_vm1, %v545_v47  ;;  %318 = vst.msk [vmem:[#allocation3 + $0xa0] sm:$0xff] %vm279_vm1, %v545_v47  ;;  %v969_v55 = vld [vmem:[%s2756_s5] sm:$0xff] }
 0x107   :  { %v548_v48 = vld [vmem:[#allocation2 + $0x68] sm:$0xff]  ;;  %v574_v21 = vld [vmem:[#allocation3 + $0x58] sm:$0xff] }
 0x108   :  { %352 = vrot.lane.b32.xlu0 %v540_v25, %s1941_s13  ;;  %496 = vrot.lane.b32.xlu1 %v541_v36, %s1942_s17  ;;  %560 = vst.msk [vmem:[#allocation3 + $0x98] sm:$0xff] %vm279_vm1, %v548_v48  ;;  %v547_v49 = vld [vmem:[#allocation2 + $0x60] sm:$0xff] }
 0x109   :  { %559 = vst.msk [vmem:[#allocation3 + $0x88] sm:$0xff] %vm279_vm1, %v547_v49  ;;  %v572_v17 = vld [vmem:[#allocation3 + $0x48] sm:$0xff] }
 0x10b   :  { %v578_v31 = vld [vmem:[#allocation3 + $0x78] sm:$0xff] }
 0x10c   :  { %498 = vrot.lane.b32.xlu0 %v542_v33, %s1942_s17  ;;  %425 = vrot.lane.b32.xlu1 %v541_v36, %s1943_s18  ;;  %v550_v56 = vld [vmem:[#allocation2 + $0x78] sm:$0xff]  ;;  %v549_v40 = vld [vmem:[#allocation2 + $0x70] sm:$0xff] }
 0x10d   :  { %562 = vst.msk [vmem:[#allocation3 + $0xb8] sm:$0xff] %vm279_vm1, %v550_v56  ;;  %561 = vst.msk [vmem:[#allocation3 + $0xa8] sm:$0xff] %vm279_vm1, %v549_v40  ;;  %v576_v27 = vld [vmem:[#allocation3 + $0x68] sm:$0xff]  ;;  %v1797_v56 = vpack.c.bf16 %v986_v54, %v985_v53  ;;  %v984_v53 = vld [vmem:[%s2756_s5 + $0x78] sm:$0xff] }
 0x10f   :  { %1798 = vmatprep.subr.bf16.mxu0 %v1797_v56 }
 0x110   :  { %427 = vrot.lane.b32.xlu0 %v542_v33, %s1943_s18  ;;  %354 = vrot.lane.b32.xlu1 %v541_v36, %s1941_s13  ;;  %v580_v37 = vld [vmem:[#allocation3 + $0x88] sm:$0xff] }
 0x114   :  { %356 = vrot.lane.b32.xlu0 %v542_v33, %s1941_s13  ;;  %500 = vrot.lane.b32.xlu1 %v543_v45, %s1942_s17  ;;  %v586_v51 = vld [vmem:[#allocation3 + $0xb8] sm:$0xff] }
 0x118   :  { %502 = vrot.lane.b32.xlu0 %v544_v42, %s1942_s17  ;;  %429 = vrot.lane.b32.xlu1 %v543_v45, %s1943_s18 }
 0x11c   :  { %431 = vrot.lane.b32.xlu0 %v544_v42, %s1943_s18  ;;  %358 = vrot.lane.b32.xlu1 %v543_v45, %s1941_s13  ;;  %v584_v45 = vld [vmem:[#allocation3 + $0xa8] sm:$0xff] }
 0x120   :  { %360 = vrot.lane.b32.xlu0 %v544_v42, %s1941_s13  ;;  %504 = vrot.lane.b32.xlu1 %v545_v47, %s1942_s17  ;;  %v582_v42 = vld [vmem:[#allocation3 + $0x98] sm:$0xff] }
 0x124   :  { %506 = vrot.lane.b32.xlu0 %v546_v46, %s1942_s17  ;;  %433 = vrot.lane.b32.xlu1 %v545_v47, %s1943_s18 }
 0x128   :  { %435 = vrot.lane.b32.xlu0 %v546_v46, %s1943_s18  ;;  %362 = vrot.lane.b32.xlu1 %v545_v47, %s1941_s13 }
 0x12c   :  { %364 = vrot.lane.b32.xlu0 %v546_v46, %s1941_s13  ;;  %508 = vrot.lane.b32.xlu1 %v547_v49, %s1942_s17 }
 0x130   :  { %510 = vrot.lane.b32.xlu0 %v548_v48, %s1942_s17  ;;  %437 = vrot.lane.b32.xlu1 %v547_v49, %s1943_s18 }
 0x134   :  { %439 = vrot.lane.b32.xlu0 %v548_v48, %s1943_s18  ;;  %366 = vrot.lane.b32.xlu1 %v547_v49, %s1941_s13 }
 0x138   :  { %512 = vrot.lane.b32.xlu1 %v549_v40, %s1942_s17  ;;  %v970_v40 = vld [vmem:[%s2756_s5 + $0x8] sm:$0xff] }
 0x162   :  { %v345_v57 = vpop.permute.xlu0 %344 }
 0x163   :  { %381 = vst.msk [vmem:[#allocation3] sm:$0xff] %vm380_vm2, %v345_v57  ;;  %v987_v57 = vld [vmem:[%s2756_s5 + $0x90] sm:$0xff] }
 0x166   :  { %v491_v58 = vpop.permute.xlu1 %490  ;;  %v420_v59 = vpop.permute.xlu0 %419 }
 0x16a   :  { %v349_v60 = vpop.permute.xlu0 %348  ;;  %v347_v61 = vpop.permute.xlu1 %346 }
 0x16b   :  { %383 = vst.msk [vmem:[#allocation3 + $0x20] sm:$0xff] %vm380_vm2, %v349_v60  ;;  %382 = vst.msk [vmem:[#allocation3 + $0x10] sm:$0xff] %vm380_vm2, %v347_v61  ;;  %v971_v61 = vld [vmem:[%s2756_s5 + $0x10] sm:$0xff] }
 0x16c   :  { %455 = vst.msk [vmem:[#allocation3 + $0x10] sm:$0xff] %vm453_vm3, %v420_v59  ;;  %v1799_v59 = vpack.c.bf16 %v970_v40, %v969_v55 }
 0x16e   :  { %v418_v62 = vpop.permute.xlu0 %417  ;;  %v493_v63 = vpop.permute.xlu1 %492  ;;  %1800 = vmatpush3.bf16.msra.mxu0 %v1799_v59 }
 0x16f   :  { %454 = vst.msk [vmem:[#allocation3] sm:$0xff] %vm453_vm3, %v418_v62  ;;  %v972_v62 = vld [vmem:[%s2756_s5 + $0x18] sm:$0xff] }
 0x170   :  { %528 = vst.msk [vmem:[#allocation3 + $0x10] sm:$0xff] %vm526_vm4, %v493_v63  ;;  %527 = vst.msk [vmem:[#allocation3] sm:$0xff] %vm526_vm4, %v491_v58  ;;  %v988_v58 = vld [vmem:[%s2756_s5 + $0x98] sm:$0xff]  ;;  %v989_v63 = vld [vmem:[%s2756_s5 + $0xa0] sm:$0xff] }
 0x171   :  { %v1801_v60 = vpack.c.bf16 %v988_v58, %v987_v57 }
 0x172   :  { %v495_v0 = vpop.permute.xlu0 %494  ;;  %v422_v1 = vpop.permute.xlu1 %421 }
 0x173   :  { %456 = vst.msk [vmem:[#allocation3 + $0x20] sm:$0xff] %vm453_vm3, %v422_v1  ;;  %v1803_v1 = vpack.c.bf16 %v972_v62, %v971_v61  ;;  %1802 = vmatprep.subr.bf16.mxu0 %v1801_v60 }
 0x174   :  { %529 = vst.msk [vmem:[#allocation3 + $0x20] sm:$0xff] %vm526_vm4, %v495_v0  ;;  %v990_v0 = vld [vmem:[%s2756_s5 + $0xa8] sm:$0xff] }
 0x175   :  { %1804 = vmatpush3.bf16.msra.mxu0 %v1803_v1 }
 0x176   :  { %v424_v2 = vpop.permute.xlu0 %423  ;;  %v351_v3 = vpop.permute.xlu1 %350 }
 0x177   :  { %384 = vst.msk [vmem:[#allocation3 + $0x30] sm:$0xff] %vm380_vm2, %v351_v3  ;;  %v563_v4 = vld [vmem:[#allocation3] sm:$0xff]  ;;  %v565_v8 = vld [vmem:[#allocation3 + $0x10] sm:$0xff] }
 0x178   :  { %457 = vst.msk [vmem:[#allocation3 + $0x30] sm:$0xff] %vm453_vm3, %v424_v2  ;;  %715 = vmatmul.mubr.f32.vlgmr.msra.gmra.mrb[0].mxu1 %v563_v4  ;;  %v1805_v2 = vpack.c.bf16 %v990_v0, %v989_v63  ;;  %v973_v3 = vld [vmem:[%s2756_s5 + $0x20] sm:$0xff]  ;;  %v974_v4 = vld [vmem:[%s2756_s5 + $0x28] sm:$0xff] }
 0x179   :  { %1584 = vmatprep.mubr.msk.f32.mxu1 %vm279_vm1, %v566_v5  ;;  %v991_v5 = vld [vmem:[%s2756_s5 + $0xb0] sm:$0xff] }
 0x17a   :  { %v353_v6 = vpop.permute.xlu0 %352  ;;  %v497_v7 = vpop.permute.xlu1 %496  ;;  %1806 = vmatprep.subr.bf16.mxu0 %v1805_v2 }
 0x17b   :  { %385 = vst.msk [vmem:[#allocation3 + $0x40] sm:$0xff] %vm380_vm2, %v353_v6  ;;  %v567_v12 = vld [vmem:[#allocation3 + $0x20] sm:$0xff]  ;;  %v992_v6 = vld [vmem:[%s2756_s5 + $0xb8] sm:$0xff] }
 0x17c   :  { %530 = vst.msk [vmem:[#allocation3 + $0x30] sm:$0xff] %vm526_vm4, %v497_v7  ;;  %720 = vmatmul.mubr.f32.gmra.mrb[2].mxu1 %v565_v8  ;;  %v1807_v7 = vpack.c.bf16 %v974_v4, %v973_v3  ;;  %v1809_v8 = vpack.c.bf16 %v992_v6, %v991_v5 }
 0x17d   :  { %1585 = vmatprep.mubr.msk.f32.mxu1 %vm279_vm1, %v568_v9  ;;  %v975_v9 = vld [vmem:[%s2756_s5 + $0x30] sm:$0xff] }
 0x17e   :  { %v499_v10 = vpop.permute.xlu0 %498  ;;  %v426_v11 = vpop.permute.xlu1 %425  ;;  %1808 = vmatpush3.bf16.msra.mxu0 %v1807_v7 }
 0x17f   :  { %458 = vst.msk [vmem:[#allocation3 + $0x40] sm:$0xff] %vm453_vm3, %v426_v11  ;;  %1810 = vmatprep.subr.bf16.mxu0 %v1809_v8 }
 0x180   :  { %531 = vst.msk [vmem:[#allocation3 + $0x40] sm:$0xff] %vm526_vm4, %v499_v10  ;;  %725 = vmatmul.mubr.f32.gmra.mrb[4].mxu1 %v567_v12  ;;  %v976_v10 = vld [vmem:[%s2756_s5 + $0x38] sm:$0xff]  ;;  %v2354_v12 = vld [vmem:[%s2755_s4] ss:$0 sm:$0xff] }
 0x181   :  { %1586 = vmatprep.mubr.msk.f32.mxu1 %vm279_vm1, %v570_v13  ;;  %v1811_v11 = vpack.c.bf16 %v976_v10, %v975_v9 }
 0x182   :  { %v428_v14 = vpop.permute.xlu0 %427  ;;  %v355_v15 = vpop.permute.xlu1 %354 }
 0x183   :  { %v569_v16 = vld [vmem:[#allocation3 + $0x30] sm:$0xff]  ;;  %386 = vst.msk [vmem:[#allocation3 + $0x50] sm:$0xff] %vm380_vm2, %v355_v15  ;;  %1812 = vmatpush3.bf16.msra.mxu0 %v1811_v11 }
 0x184   :  { %459 = vst.msk [vmem:[#allocation3 + $0x50] sm:$0xff] %vm453_vm3, %v428_v14  ;;  %730 = vmatmul.mubr.f32.gmra.mrb[6].mxu1 %v569_v16  ;;  %v993_v16 = vld [vmem:[%s2756_s5 + $0xc0] sm:$0xff] }
 0x185   :  { %1587 = vmatprep.mubr.msk.f32.mxu1 %vm279_vm1, %v572_v17  ;;  %v994_v17 = vld [vmem:[%s2756_s5 + $0xc8] sm:$0xff] }
 0x186   :  { %v357_v18 = vpop.permute.xlu0 %356  ;;  %v501_v19 = vpop.permute.xlu1 %500 }
 0x187   :  { %387 = vst.msk [vmem:[#allocation3 + $0x60] sm:$0xff] %vm380_vm2, %v357_v18  ;;  %v571_v20 = vld [vmem:[#allocation3 + $0x40] sm:$0xff] }
 0x188   :  { %532 = vst.msk [vmem:[#allocation3 + $0x50] sm:$0xff] %vm526_vm4, %v501_v19  ;;  %735 = vmatmul.mubr.f32.gmra.mrb[8].mxu1 %v571_v20  ;;  %v1813_v19 = vpack.c.bf16 %v994_v17, %v993_v16  ;;  %v977_v20 = vld [vmem:[%s2756_s5 + $0x40] sm:$0xff] }
 0x189   :  { %1588 = vmatprep.mubr.msk.f32.mxu1 %vm279_vm1, %v574_v21  ;;  %v978_v21 = vld [vmem:[%s2756_s5 + $0x48] sm:$0xff]  ;;  %v1001_v17 = vld [vmem:[%s2756_s5 + $0x100] sm:$0xff] }
 0x18a   :  { %v503_v22 = vpop.permute.xlu0 %502  ;;  %v430_v23 = vpop.permute.xlu1 %429  ;;  %1814 = vmatprep.subr.bf16.mxu0 %v1813_v19 }
 0x18b   :  { %460 = vst.msk [vmem:[#allocation3 + $0x60] sm:$0xff] %vm453_vm3, %v430_v23  ;;  %v1815_v23 = vpack.c.bf16 %v978_v21, %v977_v20 }
 0x18c   :  { %533 = vst.msk [vmem:[#allocation3 + $0x60] sm:$0xff] %vm526_vm4, %v503_v22 }
 0x18d   :  { %1816 = vmatpush3.bf16.msra.mxu0 %v1815_v23 }
 0x18e   :  { %v432_v24 = vpop.permute.xlu0 %431  ;;  %v359_v25 = vpop.permute.xlu1 %358 }
 0x18f   :  { %v573_v26 = vld [vmem:[#allocation3 + $0x50] sm:$0xff]  ;;  %388 = vst.msk [vmem:[#allocation3 + $0x70] sm:$0xff] %vm380_vm2, %v359_v25 }
 0x190   :  { %740 = vmatmul.mubr.f32.gmra.mrb[10].mxu1 %v573_v26  ;;  %461 = vst.msk [vmem:[#allocation3 + $0x70] sm:$0xff] %vm453_vm3, %v432_v24  ;;  %v995_v26 = vld [vmem:[%s2756_s5 + $0xd0] sm:$0xff] }
 0x191   :  { %1589 = vmatprep.mubr.msk.f32.mxu1 %vm279_vm1, %v576_v27  ;;  %v996_v27 = vld [vmem:[%s2756_s5 + $0xd8] sm:$0xff] }
 0x192   :  { %v361_v28 = vpop.permute.xlu0 %360  ;;  %v505_v29 = vpop.permute.xlu1 %504 }
 0x193   :  { %389 = vst.msk [vmem:[#allocation3 + $0x80] sm:$0xff] %vm380_vm2, %v361_v28  ;;  %v575_v30 = vld [vmem:[#allocation3 + $0x60] sm:$0xff] }
 0x194   :  { %534 = vst.msk [vmem:[#allocation3 + $0x70] sm:$0xff] %vm526_vm4, %v505_v29  ;;  %745 = vmatmul.mubr.f32.gmra.mrb[12].mxu1 %v575_v30  ;;  %v1817_v29 = vpack.c.bf16 %v996_v27, %v995_v26  ;;  %v979_v30 = vld [vmem:[%s2756_s5 + $0x50] sm:$0xff] }
 0x195   :  { %1590 = vmatprep.mubr.msk.f32.mxu1 %vm279_vm1, %v578_v31  ;;  %v980_v31 = vld [vmem:[%s2756_s5 + $0x58] sm:$0xff] }
 0x196   :  { %v507_v32 = vpop.permute.xlu0 %506  ;;  %v434_v33 = vpop.permute.xlu1 %433  ;;  %1818 = vmatprep.subr.bf16.mxu0 %v1817_v29 }
 0x197   :  { %462 = vst.msk [vmem:[#allocation3 + $0x80] sm:$0xff] %vm453_vm3, %v434_v33  ;;  %v1819_v33 = vpack.c.bf16 %v980_v31, %v979_v30 }
 0x198   :  { %535 = vst.msk [vmem:[#allocation3 + $0x80] sm:$0xff] %vm526_vm4, %v507_v32 }
 0x199   :  { %1820 = vmatpush3.bf16.msra.mxu0 %v1819_v33 }
 0x19a   :  { %v436_v34 = vpop.permute.xlu0 %435  ;;  %v363_v35 = vpop.permute.xlu1 %362 }
 0x19b   :  { %v577_v36 = vld [vmem:[#allocation3 + $0x70] sm:$0xff]  ;;  %390 = vst.msk [vmem:[#allocation3 + $0x90] sm:$0xff] %vm380_vm2, %v363_v35 }
 0x19c   :  { %750 = vmatmul.mubr.f32.gmra.mrb[14].mxu1 %v577_v36  ;;  %463 = vst.msk [vmem:[#allocation3 + $0x90] sm:$0xff] %vm453_vm3, %v436_v34  ;;  %v997_v36 = vld [vmem:[%s2756_s5 + $0xe0] sm:$0xff] }
 0x19d   :  { %1591 = vmatprep.mubr.msk.f32.mxu1 %vm279_vm1, %v580_v37  ;;  %v998_v37 = vld [vmem:[%s2756_s5 + $0xe8] sm:$0xff] }
 0x19e   :  { %v365_v38 = vpop.permute.xlu0 %364  ;;  %v509_v39 = vpop.permute.xlu1 %508 }
 0x19f   :  { %391 = vst.msk [vmem:[#allocation3 + $0xa0] sm:$0xff] %vm380_vm2, %v365_v38  ;;  %v579_v41 = vld [vmem:[#allocation3 + $0x80] sm:$0xff] }
 0x1a0   :  { %536 = vst.msk [vmem:[#allocation3 + $0x90] sm:$0xff] %vm526_vm4, %v509_v39  ;;  %755 = vmatmul.mubr.f32.gmra.mrb[16].mxu1 %v579_v41  ;;  %v1821_v39 = vpack.c.bf16 %v998_v37, %v997_v36  ;;  %v981_v41 = vld [vmem:[%s2756_s5 + $0x60] sm:$0xff] }
 0x1a1   :  { %1592 = vmatprep.mubr.msk.f32.mxu1 %vm279_vm1, %v582_v42  ;;  %v982_v42 = vld [vmem:[%s2756_s5 + $0x68] sm:$0xff] }
 0x1a2   :  { %v511_v43 = vpop.permute.xlu0 %510  ;;  %v438_v44 = vpop.permute.xlu1 %437  ;;  %1822 = vmatprep.subr.bf16.mxu0 %v1821_v39 }
 0x1a3   :  { %464 = vst.msk [vmem:[#allocation3 + $0xa0] sm:$0xff] %vm453_vm3, %v438_v44 }
 0x1a4   :  { %537 = vst.msk [vmem:[#allocation3 + $0xa0] sm:$0xff] %vm526_vm4, %v511_v43 }
 0x1a6   :  { %v440_v46 = vpop.permute.xlu0 %439  ;;  %v367_v47 = vpop.permute.xlu1 %366 }
 0x1a7   :  { %v581_v48 = vld [vmem:[#allocation3 + $0x90] sm:$0xff]  ;;  %392 = vst.msk [vmem:[#allocation3 + $0xb0] sm:$0xff] %vm380_vm2, %v367_v47 }
 0x1a8   :  { %760 = vmatmul.mubr.f32.gmra.mrb[18].mxu1 %v581_v48  ;;  %465 = vst.msk [vmem:[#allocation3 + $0xb0] sm:$0xff] %vm453_vm3, %v440_v46  ;;  %v999_v48 = vld [vmem:[%s2756_s5 + $0xf0] sm:$0xff] }
 0x1a9   :  { %1593 = vmatprep.mubr.msk.f32.mxu1 %vm279_vm1, %v584_v45  ;;  %v1823_v45 = vpack.c.bf16 %v982_v42, %v981_v41 }
 0x1aa   :  { %v513_v49 = vpop.permute.xlu1 %512 }
 0x1ab   :  { %v583_v50 = vld [vmem:[#allocation3 + $0xa0] sm:$0xff]  ;;  %538 = vst.msk [vmem:[#allocation3 + $0xb0] sm:$0xff] %vm526_vm4, %v513_v49  ;;  %1824 = vmatpush3.bf16.msra.mxu0 %v1823_v45  ;;  %v1000_v49 = vld [vmem:[%s2756_s5 + $0xf8] sm:$0xff] }
 0x1ac   :  { %765 = vmatmul.mubr.f32.gmra.mrb[20].mxu1 %v583_v50 }
 0x1ad   :  { %1594 = vmatprep.mubr.msk.f32.mxu1 %vm279_vm1, %v586_v51  ;;  %v1825_v51 = vpack.c.bf16 %v1000_v49, %v999_v48  ;;  %v1005_v48 = vld [vmem:[%s2756_s5 + $0x120] sm:$0xff]  ;;  %v1006_v49 = vld [vmem:[%s2756_s5 + $0x128] sm:$0xff] }
 0x1af   :  { %1826 = vmatprep.subr.bf16.mxu0 %v1825_v51 }
 0x1b2   :  { %v585_v52 = vld [vmem:[#allocation3 + $0xb0] sm:$0xff] }
 0x1b3   :  { %770 = vmatmul.mubr.f32.gmra.mrb[22].mxu1 %v585_v52  ;;  %v983_v52 = vld [vmem:[%s2756_s5 + $0x70] sm:$0xff] }
 0x1b4   :  { %v1827_v56 = vpack.c.bf16 %v984_v53, %v983_v52  ;;  %v1837_v53 = vpack.c.bf16 %v1006_v49, %v1005_v48  ;;  %v1324_v49 = vld [vmem:[%s2758_s7 + $0x80] sm:$0xff] }
 0x1b6   :  { %1828 = vmatpush3.bf16.msra.mxu0 %v1827_v56  ;;  %v1008_v56 = vld [vmem:[%s2756_s5 + $0x138] sm:$0xff] }
 0x24b   :  { %v716_v13 = vpop.f32.mrb[0].mxu1 }
 0x24c   :  { %v717_v14 = vadd.f32 %v2354_v12, %v716_v13  ;;  %v718_v15 = vpop.f32.mrb[1].mxu1 }
 0x24e   :  { %v775_v18 = vmax.f32 %v717_v14, 0.0 }
 0x24f   :  { %v721_v22 = vpop.f32.mrb[2].mxu1 }
 0x250   :  { %788 = vst.msk [vmem:[#allocation4] sm:$0xff] %vm787_vm5, %v775_v18  ;;  %v722_v24 = vadd.f32 %v2354_v12, %v721_v22  ;;  %v723_v25 = vpop.f32.mrb[3].mxu1  ;;  %v1002_v18 = vld [vmem:[%s2756_s5 + $0x108] sm:$0xff] }
 0x251   :  { %v1829_v19 = vpack.c.bf16 %v1002_v18, %v1001_v17 }
 0x252   :  { %v776_v28 = vmax.f32 %v722_v24, 0.0 }
 0x253   :  { %v726_v32 = vpop.f32.mrb[4].mxu1  ;;  %1830 = vmatprep.subr.bf16.mxu0 %v1829_v19 }
 0x254   :  { %789 = vst.msk [vmem:[#allocation4 + $0x8] sm:$0xff] %vm787_vm5, %v776_v28  ;;  %v727_v34 = vadd.f32 %v2354_v12, %v726_v32  ;;  %v728_v35 = vpop.f32.mrb[5].mxu1 }
 0x256   :  { %v777_v38 = vmax.f32 %v727_v34, 0.0 }
 0x257   :  { %v731_v43 = vpop.f32.mrb[6].mxu1  ;;  %v800_v44 = vld [vmem:[#allocation4] sm:$0xff] }
 0x258   :  { %790 = vst.msk [vmem:[#allocation4 + $0x10] sm:$0xff] %vm787_vm5, %v777_v38  ;;  %v732_v46 = vadd.f32 %v2354_v12, %v731_v43  ;;  %v733_v47 = vpop.f32.mrb[7].mxu1  ;;  %808 = vst.msk [vmem:[#allocation5] sm:$0xff] %vm787_vm5, %v800_v44  ;;  %v1003_v43 = vld [vmem:[%s2756_s5 + $0x110] sm:$0xff]  ;;  %v1004_v44 = vld [vmem:[%s2756_s5 + $0x118] sm:$0xff] }
 0x25a   :  { %v778_v50 = vmax.f32 %v732_v46, 0.0  ;;  %v1833_v46 = vpack.c.bf16 %v1004_v44, %v1003_v43  ;;  %v1320_v43 = vld [vmem:[%s2758_s7 + $0x60] sm:$0xff]  ;;  %v1322_v44 = vld [vmem:[%s2758_s7 + $0x70] sm:$0xff] }
 0x25b   :  { %v736_v54 = vpop.f32.mrb[8].mxu1  ;;  %v816_v55 = vld [vmem:[#allocation4 + $0x8] sm:$0xff] }
 0x25c   :  { %791 = vst.msk [vmem:[#allocation4 + $0x18] sm:$0xff] %vm787_vm5, %v778_v50  ;;  %v737_v40 = vadd.f32 %v2354_v12, %v736_v54  ;;  %v738_v57 = vpop.f32.mrb[9].mxu1  ;;  %832 = vrot.lane.b32.xlu1 %v816_v55, %s1943_s18  ;;  %809 = vst.msk [vmem:[#allocation5 + $0x18] sm:$0xff] %vm787_vm5, %v816_v55  ;;  %v1007_v55 = vld [vmem:[%s2756_s5 + $0x130] sm:$0xff] }
 0x25e   :  { %v779_v58 = vmax.f32 %v737_v40, 0.0 }
 0x25f   :  { %v817_v59 = vld [vmem:[#allocation4 + $0x10] sm:$0xff] }
 0x260   :  { %792 = vst.msk [vmem:[#allocation4 + $0x20] sm:$0xff] %vm787_vm5, %v779_v58  ;;  %834 = vrot.lane.b32.xlu1 %v817_v59, %s1943_s18  ;;  %873 = vst.msk [vmem:[#allocation5 + $0x8] sm:$0xff] %vm787_vm5, %v817_v59  ;;  %v1841_v58 = vpack.c.bf16 %v1008_v56, %v1007_v55  ;;  %v1328_v55 = vld [vmem:[%s2758_s7 + $0xa0] sm:$0xff]  ;;  %v1330_v56 = vld [vmem:[%s2758_s7 + $0xb0] sm:$0xff] }
 0x261   :  { %810 = vst.msk [vmem:[#allocation5 + $0x30] sm:$0xff] %vm787_vm5, %v817_v59 }
 0x263   :  { %v741_v60 = vpop.f32.mrb[10].mxu1  ;;  %v881_v63 = vld [vmem:[#allocation4 + $0x18] sm:$0xff] }
 0x264   :  { %v742_v61 = vadd.f32 %v2354_v12, %v741_v60  ;;  %v743_v62 = vpop.f32.mrb[11].mxu1  ;;  %897 = vrot.lane.b32.xlu0 %v881_v63, %s1943_s18  ;;  %836 = vrot.lane.b32.xlu1 %v881_v63, %s1943_s18  ;;  %874 = vst.msk [vmem:[#allocation5 + $0x20] sm:$0xff] %vm787_vm5, %v881_v63  ;;  %811 = vst.msk [vmem:[#allocation5 + $0x48] sm:$0xff] %vm787_vm5, %v881_v63 }
 0x266   :  { %v780_v0 = vmax.f32 %v742_v61, 0.0 }
 0x267   :  { %v929_v1 = vld [vmem:[#allocation4 + $0x20] sm:$0xff]  ;;  %v746_v2 = vpop.f32.mrb[12].mxu1 }
 0x268   :  { %793 = vst.msk [vmem:[#allocation4 + $0x28] sm:$0xff] %vm787_vm5, %v780_v0  ;;  %937 = vst.msk [vmem:[#allocation5 + $0x10] sm:$0xff] %vm787_vm5, %v929_v1  ;;  %v747_v3 = vadd.f32 %v2354_v12, %v746_v2  ;;  %v748_v4 = vpop.f32.mrb[13].mxu1  ;;  %899 = vrot.lane.b32.xlu0 %v929_v1, %s1943_s18  ;;  %838 = vrot.lane.b32.xlu1 %v929_v1, %s1943_s18 }
 0x269   :  { %875 = vst.msk [vmem:[#allocation5 + $0x38] sm:$0xff] %vm787_vm5, %v929_v1  ;;  %812 = vst.msk [vmem:[#allocation5 + $0x60] sm:$0xff] %vm787_vm5, %v929_v1 }
 0x26a   :  { %v781_v5 = vmax.f32 %v747_v3, 0.0 }
 0x26c   :  { %794 = vst.msk [vmem:[#allocation4 + $0x30] sm:$0xff] %vm787_vm5, %v781_v5 }
 0x26f   :  { %v930_v6 = vld [vmem:[#allocation4 + $0x28] sm:$0xff]  ;;  %v751_v7 = vpop.f32.mrb[14].mxu1 }
 0x270   :  { %938 = vst.msk [vmem:[#allocation5 + $0x28] sm:$0xff] %vm787_vm5, %v930_v6  ;;  %v752_v8 = vadd.f32 %v2354_v12, %v751_v7  ;;  %v753_v9 = vpop.f32.mrb[15].mxu1  ;;  %901 = vrot.lane.b32.xlu0 %v930_v6, %s1943_s18  ;;  %840 = vrot.lane.b32.xlu1 %v930_v6, %s1943_s18  ;;  %876 = vst.msk [vmem:[#allocation5 + $0x50] sm:$0xff] %vm787_vm5, %v930_v6 }
 0x271   :  { %813 = vst.msk [vmem:[#allocation5 + $0x78] sm:$0xff] %vm787_vm5, %v930_v6 }
 0x272   :  { %v782_v10 = vmax.f32 %v752_v8, 0.0 }
 0x273   :  { %v931_v11 = vld [vmem:[#allocation4 + $0x30] sm:$0xff]  ;;  %v756_v13 = vpop.f32.mrb[16].mxu1 }
 0x274   :  { %795 = vst.msk [vmem:[#allocation4 + $0x38] sm:$0xff] %vm787_vm5, %v782_v10  ;;  %939 = vst.msk [vmem:[#allocation5 + $0x40] sm:$0xff] %vm787_vm5, %v931_v11  ;;  %v757_v14 = vadd.f32 %v2354_v12, %v756_v13  ;;  %v758_v15 = vpop.f32.mrb[17].mxu1  ;;  %903 = vrot.lane.b32.xlu0 %v931_v11, %s1943_s18  ;;  %842 = vrot.lane.b32.xlu1 %v931_v11, %s1943_s18 }
 0x275   :  { %877 = vst.msk [vmem:[#allocation5 + $0x68] sm:$0xff] %vm787_vm5, %v931_v11  ;;  %814 = vst.msk [vmem:[#allocation5 + $0x90] sm:$0xff] %vm787_vm5, %v931_v11 }
 0x276   :  { %v783_v16 = vmax.f32 %v757_v14, 0.0  ;;  %v947_v14 = vld [vmem:[#allocation5 + $0x10] sm:$0xff] }
 0x277   :  { %v950_v15 = vld [vmem:[#allocation5 + $0x28] sm:$0xff] }
 0x278   :  { %796 = vst.msk [vmem:[#allocation4 + $0x40] sm:$0xff] %vm787_vm5, %v783_v16 }
 0x27b   :  { %v932_v20 = vld [vmem:[#allocation4 + $0x38] sm:$0xff]  ;;  %v761_v21 = vpop.f32.mrb[18].mxu1  ;;  %v953_v16 = vld [vmem:[#allocation5 + $0x40] sm:$0xff] }
 0x27c   :  { %940 = vst.msk [vmem:[#allocation5 + $0x58] sm:$0xff] %vm787_vm5, %v932_v20  ;;  %v762_v22 = vadd.f32 %v2354_v12, %v761_v21  ;;  %v763_v23 = vpop.f32.mrb[19].mxu1  ;;  %905 = vrot.lane.b32.xlu0 %v932_v20, %s1943_s18  ;;  %844 = vrot.lane.b32.xlu1 %v932_v20, %s1943_s18  ;;  %878 = vst.msk [vmem:[#allocation5 + $0x80] sm:$0xff] %vm787_vm5, %v932_v20 }
 0x27d   :  { %815 = vst.msk [vmem:[#allocation5 + $0xa8] sm:$0xff] %vm787_vm5, %v932_v20  ;;  %v1311_v23 = vld [vmem:[%s2758_s7 + $0x18] sm:$0xff] }
 0x27e   :  { %v784_v24 = vmax.f32 %v762_v22, 0.0  ;;  %v1309_v22 = vld [vmem:[%s2758_s7 + $0x8] sm:$0xff] }
 0x27f   :  { %v933_v25 = vld [vmem:[#allocation4 + $0x40] sm:$0xff]  ;;  %v766_v26 = vpop.f32.mrb[20].mxu1 }
 0x280   :  { %797 = vst.msk [vmem:[#allocation4 + $0x48] sm:$0xff] %vm787_vm5, %v784_v24  ;;  %941 = vst.msk [vmem:[#allocation5 + $0x70] sm:$0xff] %vm787_vm5, %v933_v25  ;;  %v767_v27 = vadd.f32 %v2354_v12, %v766_v26  ;;  %v768_v28 = vpop.f32.mrb[21].mxu1  ;;  %907 = vrot.lane.b32.xlu0 %v933_v25, %s1943_s18  ;;  %846 = vrot.lane.b32.xlu1 %v933_v25, %s1943_s18  ;;  %v1308_v24 = vld [vmem:[%s2758_s7] sm:$0xff]  ;;  %v1310_v26 = vld [vmem:[%s2758_s7 + $0x10] sm:$0xff] }
 0x281   :  { %879 = vst.msk [vmem:[#allocation5 + $0x98] sm:$0xff] %vm787_vm5, %v933_v25  ;;  %v1845_v25 = vpack.c.bf16 %v1311_v23, %v1309_v22  ;;  %v1315_v28 = vld [vmem:[%s2758_s7 + $0x38] sm:$0xff] }
 0x282   :  { %v785_v29 = vmax.f32 %v767_v27, 0.0  ;;  %v1313_v27 = vld [vmem:[%s2758_s7 + $0x28] sm:$0xff] }
 0x283   :  { %v956_v17 = vld [vmem:[#allocation5 + $0x58] sm:$0xff]  ;;  %1846 = vmatprep.subr.bf16.mxu1 %v1845_v25 }
 0x284   :  { %798 = vst.msk [vmem:[#allocation4 + $0x50] sm:$0xff] %vm787_vm5, %v785_v29  ;;  %v1847_v29 = vpack.c.bf16 %v1310_v26, %v1308_v24 }
 0x286   :  { %v771_v31 = vpop.f32.mrb[22].mxu1  ;;  %1848 = vmatpush1.bf16.msra.mxu1 %v1847_v29 }
 0x287   :  { %v934_v30 = vld [vmem:[#allocation4 + $0x48] sm:$0xff]  ;;  %v772_v32 = vadd.f32 %v2354_v12, %v771_v31  ;;  %v773_v33 = vpop.f32.mrb[23].mxu1  ;;  %v959_v18 = vld [vmem:[#allocation5 + $0x70] sm:$0xff]  ;;  %v1312_v31 = vld [vmem:[%s2758_s7 + $0x20] sm:$0xff] }
 0x288   :  { %942 = vst.msk [vmem:[#allocation5 + $0x88] sm:$0xff] %vm787_vm5, %v934_v30  ;;  %909 = vrot.lane.b32.xlu0 %v934_v30, %s1943_s18  ;;  %880 = vst.msk [vmem:[#allocation5 + $0xb0] sm:$0xff] %vm787_vm5, %v934_v30  ;;  %v1849_v30 = vpack.c.bf16 %v1315_v28, %v1313_v27  ;;  %v1317_v33 = vld [vmem:[%s2758_s7 + $0x48] sm:$0xff] }
 0x289   :  { %v786_v34 = vmax.f32 %v772_v32, 0.0  ;;  %v1314_v32 = vld [vmem:[%s2758_s7 + $0x30] sm:$0xff] }
 0x28a   :  { %1850 = vmatprep.subr.bf16.mxu1 %v1849_v30 }
 0x28b   :  { %v935_v35 = vld [vmem:[#allocation4 + $0x50] sm:$0xff]  ;;  %799 = vst.msk [vmem:[#allocation4 + $0x58] sm:$0xff] %vm787_vm5, %v786_v34  ;;  %v1319_v34 = vld [vmem:[%s2758_s7 + $0x58] sm:$0xff] }
 0x28c   :  { %943 = vst.msk [vmem:[#allocation5 + $0xa0] sm:$0xff] %vm787_vm5, %v935_v35  ;;  %911 = vrot.lane.b32.xlu0 %v935_v35, %s1943_s18  ;;  %v1851_v35 = vpack.c.bf16 %v1314_v32, %v1312_v31 }
 0x28e   :  { %1852 = vmatpush1.bf16.msra.mxu1 %v1851_v35 }
 0x292   :  { %v936_v36 = vld [vmem:[#allocation4 + $0x58] sm:$0xff] }
 0x293   :  { %944 = vst.msk [vmem:[#allocation5 + $0xb8] sm:$0xff] %vm787_vm5, %v936_v36  ;;  %v965_v20 = vld [vmem:[#allocation5 + $0xa0] sm:$0xff]  ;;  %v1853_v36 = vpack.c.bf16 %v1319_v34, %v1317_v33 }
 0x295   :  { %1854 = vmatprep.subr.bf16.mxu1 %v1853_v36 }
 0x29a   :  { %v968_v21 = vld [vmem:[#allocation5 + $0xb8] sm:$0xff] }
 0x2ce   :  { %v833_v37 = vpop.permute.xlu1 %832 }
 0x2cf   :  { %857 = vst.msk [vmem:[#allocation5] sm:$0xff] %vm856_vm6, %v833_v37  ;;  %v1316_v37 = vld [vmem:[%s2758_s7 + $0x40] sm:$0xff] }
 0x2d2   :  { %v835_v38 = vpop.permute.xlu1 %834 }
 0x2d3   :  { %858 = vst.msk [vmem:[#allocation5 + $0x18] sm:$0xff] %vm856_vm6, %v835_v38  ;;  %v1318_v38 = vld [vmem:[%s2758_s7 + $0x50] sm:$0xff] }
 0x2d6   :  { %v898_v12 = vpop.permute.xlu0 %897  ;;  %v837_v39 = vpop.permute.xlu1 %836  ;;  %v945_v47 = vld [vmem:[#allocation5] sm:$0xff] }
 0x2d7   :  { %921 = vst.msk [vmem:[#allocation5 + $0x8] sm:$0xff] %vm856_vm6, %v898_v12  ;;  %859 = vst.msk [vmem:[#allocation5 + $0x30] sm:$0xff] %vm856_vm6, %v837_v39  ;;  %v1321_v12 = vld [vmem:[%s2758_s7 + $0x68] sm:$0xff]  ;;  %v1323_v39 = vld [vmem:[%s2758_s7 + $0x78] sm:$0xff] }
 0x2da   :  { %v900_v41 = vpop.permute.xlu0 %899  ;;  %v839_v42 = vpop.permute.xlu1 %838  ;;  %v948_v54 = vld [vmem:[#allocation5 + $0x18] sm:$0xff] }
 0x2db   :  { %922 = vst.msk [vmem:[#allocation5 + $0x20] sm:$0xff] %vm856_vm6, %v900_v41  ;;  %860 = vst.msk [vmem:[#allocation5 + $0x48] sm:$0xff] %vm856_vm6, %v839_v42  ;;  %v1855_v41 = vpack.c.bf16 %v1318_v38, %v1316_v37  ;;  %v1857_v42 = vpack.c.bf16 %v1323_v39, %v1321_v12 }
 0x2dd   :  { %1856 = vmatpush1.bf16.msra.mxu1 %v1855_v41  ;;  %v1595_v41 = vld [vmem:[%s2757_s6] ss:$0 sm:$0xff] }
 0x2de   :  { %v946_v45 = vld [vmem:[#allocation5 + $0x8] sm:$0xff]  ;;  %v951_v60 = vld [vmem:[#allocation5 + $0x30] sm:$0xff]  ;;  %1858 = vmatprep.subr.bf16.mxu1 %v1857_v42 }
 0x2df   :  { %1104 = vmatprep.mubr.f32.mxu0 %v946_v45  ;;  %v1325_v45 = vld [vmem:[%s2758_s7 + $0x88] sm:$0xff] }
 0x2e0   :  { %1105 = vmatmul.mubr.f32.vlgmr.msra.gmra.mrb[16].mxu0 %v945_v47  ;;  %v1859_v47 = vpack.c.bf16 %v1322_v44, %v1320_v43  ;;  %v1349_v44 = vld [vmem:[%s2758_s7 + $0x148] sm:$0xff] }
 0x2e1   :  { %1832 = vmatpush3.bf16.msra.mxu0 %v1829_v19  ;;  %v962_v19 = vld [vmem:[#allocation5 + $0x88] sm:$0xff] }
 0x2e2   :  { %v902_v50 = vpop.permute.xlu0 %901  ;;  %v841_v51 = vpop.permute.xlu1 %840  ;;  %v949_v52 = vld [vmem:[#allocation5 + $0x20] sm:$0xff]  ;;  %1834 = vmatprep.subr.bf16.mxu0 %v1833_v46  ;;  %v954_v0 = vld [vmem:[#allocation5 + $0x48] sm:$0xff]  ;;  %1860 = vmatpush1.bf16.msra.mxu1 %v1859_v47 }
 0x2e3   :  { %923 = vst.msk [vmem:[#allocation5 + $0x38] sm:$0xff] %vm856_vm6, %v902_v50  ;;  %861 = vst.msk [vmem:[#allocation5 + $0x60] sm:$0xff] %vm856_vm6, %v841_v51  ;;  %1109 = vmatprep.mubr.f32.mxu0 %v949_v52  ;;  %v1326_v50 = vld [vmem:[%s2758_s7 + $0x90] sm:$0xff]  ;;  %v1329_v51 = vld [vmem:[%s2758_s7 + $0xa8] sm:$0xff] }
 0x2e4   :  { %1110 = vmatmul.mubr.f32.gmra.mrb[18].mxu0 %v948_v54  ;;  %v1331_v52 = vld [vmem:[%s2758_s7 + $0xb8] sm:$0xff] }
 0x2e5   :  { %1836 = vmatpush3.bf16.msra.mxu0 %v1833_v46  ;;  %v1327_v46 = vld [vmem:[%s2758_s7 + $0x98] sm:$0xff]  ;;  %v1865_v54 = vpack.c.bf16 %v1331_v52, %v1329_v51 }
 0x2e6   :  { %v904_v40 = vpop.permute.xlu0 %903  ;;  %v843_v57 = vpop.permute.xlu1 %842  ;;  %1838 = vmatprep.subr.bf16.mxu0 %v1837_v53  ;;  %v1861_v48 = vpack.c.bf16 %v1327_v46, %v1325_v45  ;;  %v1351_v45 = vld [vmem:[%s2758_s7 + $0x158] sm:$0xff] }
 0x2e7   :  { %924 = vst.msk [vmem:[#allocation5 + $0x50] sm:$0xff] %vm856_vm6, %v904_v40  ;;  %862 = vst.msk [vmem:[#allocation5 + $0x78] sm:$0xff] %vm856_vm6, %v843_v57  ;;  %v1333_v40 = vld [vmem:[%s2758_s7 + $0xc8] sm:$0xff]  ;;  %v1335_v57 = vld [vmem:[%s2758_s7 + $0xd8] sm:$0xff] }
 0x2e8   :  { %1862 = vmatprep.subr.bf16.mxu1 %v1861_v48  ;;  %v1885_v48 = vpack.c.bf16 %v1351_v45, %v1349_v44  ;;  %v1369_v44 = vld [vmem:[%s2758_s7 + $0x1e8] sm:$0xff]  ;;  %v1371_v45 = vld [vmem:[%s2758_s7 + $0x1f8] sm:$0xff] }
 0x2e9   :  { %1840 = vmatpush3.bf16.msra.mxu0 %v1837_v53  ;;  %v1863_v53 = vpack.c.bf16 %v1326_v50, %v1324_v49  ;;  %v1348_v49 = vld [vmem:[%s2758_s7 + $0x140] sm:$0xff]  ;;  %v1350_v50 = vld [vmem:[%s2758_s7 + $0x150] sm:$0xff] }
 0x2ea   :  { %v952_v59 = vld [vmem:[#allocation5 + $0x38] sm:$0xff]  ;;  %1842 = vmatprep.subr.bf16.mxu0 %v1841_v58  ;;  %v957_v4 = vld [vmem:[#allocation5 + $0x60] sm:$0xff] }
 0x2eb   :  { %1114 = vmatprep.mubr.f32.mxu0 %v952_v59  ;;  %1864 = vmatpush1.bf16.msra.mxu1 %v1863_v53  ;;  %v1869_v59 = vpack.c.bf16 %v1335_v57, %v1333_v40  ;;  %v1887_v53 = vpack.c.bf16 %v1350_v50, %v1348_v49  ;;  %v1353_v40 = vld [vmem:[%s2758_s7 + $0x168] sm:$0xff]  ;;  %v1355_v57 = vld [vmem:[%s2758_s7 + $0x178] sm:$0xff] }
 0x2ec   :  { %1115 = vmatmul.mubr.f32.gmra.mrb[20].mxu0 %v951_v60  ;;  %1866 = vmatprep.subr.bf16.mxu1 %v1865_v54  ;;  %v1332_v60 = vld [vmem:[%s2758_s7 + $0xc0] sm:$0xff] }
 0x2ed   :  { %1844 = vmatpush3.bf16.msra.mxu0 %v1841_v58  ;;  %v1867_v58 = vpack.c.bf16 %v1330_v56, %v1328_v55 }
 0x2ee   :  { %v906_v61 = vpop.permute.xlu0 %905  ;;  %v845_v62 = vpop.permute.xlu1 %844  ;;  %v955_v63 = vld [vmem:[#allocation5 + $0x50] sm:$0xff]  ;;  %v960_v7 = vld [vmem:[#allocation5 + $0x78] sm:$0xff] }
 0x2ef   :  { %925 = vst.msk [vmem:[#allocation5 + $0x68] sm:$0xff] %vm856_vm6, %v906_v61  ;;  %863 = vst.msk [vmem:[#allocation5 + $0x90] sm:$0xff] %vm856_vm6, %v845_v62  ;;  %1119 = vmatprep.mubr.f32.mxu0 %v955_v63  ;;  %v1334_v61 = vld [vmem:[%s2758_s7 + $0xd0] sm:$0xff]  ;;  %v1337_v62 = vld [vmem:[%s2758_s7 + $0xe8] sm:$0xff]  ;;  %1868 = vmatpush1.bf16.msra.mxu1 %v1867_v58 }
 0x2f0   :  { %1120 = vmatmul.mubr.f32.gmra.mrb[22].mxu0 %v954_v0  ;;  %v1339_v63 = vld [vmem:[%s2758_s7 + $0xf8] sm:$0xff]  ;;  %v1871_v0 = vpack.c.bf16 %v1334_v61, %v1332_v60  ;;  %1870 = vmatprep.subr.bf16.mxu1 %v1869_v59  ;;  %v1889_v61 = vpack.c.bf16 %v1355_v57, %v1353_v40 }
 0x2f2   :  { %v908_v1 = vpop.permute.xlu0 %907  ;;  %v847_v2 = vpop.permute.xlu1 %846 }
 0x2f3   :  { %926 = vst.msk [vmem:[#allocation5 + $0x80] sm:$0xff] %vm856_vm6, %v908_v1  ;;  %864 = vst.msk [vmem:[#allocation5 + $0xa8] sm:$0xff] %vm856_vm6, %v847_v2  ;;  %v1873_v1 = vpack.c.bf16 %v1339_v63, %v1337_v62  ;;  %v1336_v2 = vld [vmem:[%s2758_s7 + $0xe0] sm:$0xff]  ;;  %1872 = vmatpush1.bf16.msra.mxu1 %v1871_v0  ;;  %v1354_v63 = vld [vmem:[%s2758_s7 + $0x170] sm:$0xff] }
 0x2f4   :  { %v1352_v62 = vld [vmem:[%s2758_s7 + $0x160] sm:$0xff] }
 0x2f5   :  { %1874 = vmatprep.subr.bf16.mxu1 %v1873_v1 }
 0x2f6   :  { %v958_v3 = vld [vmem:[#allocation5 + $0x68] sm:$0xff]  ;;  %v963_v10 = vld [vmem:[#allocation5 + $0x90] sm:$0xff] }
 0x2f7   :  { %1124 = vmatprep.mubr.f32.mxu0 %v958_v3  ;;  %v1338_v3 = vld [vmem:[%s2758_s7 + $0xf0] sm:$0xff] }
 0x2f8   :  { %1125 = vmatmul.mubr.f32.gmra.mrb[24].mxu0 %v957_v4  ;;  %v1341_v4 = vld [vmem:[%s2758_s7 + $0x108] sm:$0xff] }
 0x2fa   :  { %v910_v5 = vpop.permute.xlu0 %909  ;;  %v961_v6 = vld [vmem:[#allocation5 + $0x80] sm:$0xff]  ;;  %v966_v13 = vld [vmem:[#allocation5 + $0xa8] sm:$0xff] }
 0x2fb   :  { %927 = vst.msk [vmem:[#allocation5 + $0x98] sm:$0xff] %vm856_vm6, %v910_v5  ;;  %1129 = vmatprep.mubr.f32.mxu0 %v961_v6  ;;  %v1343_v5 = vld [vmem:[%s2758_s7 + $0x118] sm:$0xff]  ;;  %v1875_v6 = vpack.c.bf16 %v1338_v3, %v1336_v2  ;;  %v1891_v2 = vpack.c.bf16 %v1354_v63, %v1352_v62  ;;  %v1374_v62 = vlaneseq }
 0x2fc   :  { %1130 = vmatmul.mubr.f32.gmra.mrb[26].mxu0 %v960_v7  ;;  %v1877_v7 = vpack.c.bf16 %v1343_v5, %v1341_v4 }
 0x2fd   :  { %1876 = vmatpush1.bf16.msra.mxu1 %v1875_v6  ;;  %v1357_v6 = vld [vmem:[%s2758_s7 + $0x188] sm:$0xff]  ;;  %v1375_v63 = vshrl.u32 %v1374_v62, 7 }
 0x2fe   :  { %v912_v8 = vpop.permute.xlu0 %911  ;;  %1878 = vmatprep.subr.bf16.mxu1 %v1877_v7  ;;  %v1359_v7 = vld [vmem:[%s2758_s7 + $0x198] sm:$0xff] }
 0x2ff   :  { %928 = vst.msk [vmem:[#allocation5 + $0xb0] sm:$0xff] %vm856_vm6, %v912_v8  ;;  %v1340_v8 = vld [vmem:[%s2758_s7 + $0x100] sm:$0xff] }
 0x302   :  { %v964_v9 = vld [vmem:[#allocation5 + $0x98] sm:$0xff] }
 0x303   :  { %1134 = vmatprep.mubr.f32.mxu0 %v964_v9  ;;  %v1342_v9 = vld [vmem:[%s2758_s7 + $0x110] sm:$0xff] }
 0x304   :  { %1135 = vmatmul.mubr.f32.gmra.mrb[28].mxu0 %v963_v10  ;;  %v1345_v10 = vld [vmem:[%s2758_s7 + $0x128] sm:$0xff] }
 0x306   :  { %v967_v11 = vld [vmem:[#allocation5 + $0xb0] sm:$0xff] }
 0x307   :  { %1139 = vmatprep.mubr.f32.mxu0 %v967_v11  ;;  %v1347_v11 = vld [vmem:[%s2758_s7 + $0x138] sm:$0xff] }
 0x308   :  { %1140 = vmatmul.mubr.f32.gmra.mrb[30].mxu0 %v966_v13  ;;  %v1879_v13 = vpack.c.bf16 %v1342_v9, %v1340_v8 }
 0x309   :  { %1747 = vmatprep.mubr.msk.f32.mxu0 %vm787_vm5, %v947_v14  ;;  %v1881_v14 = vpack.c.bf16 %v1347_v11, %v1345_v10  ;;  %v1893_v11 = vpack.c.bf16 %v1359_v7, %v1357_v6  ;;  %v1372_v6 = vld [vmem:[%s2759_s8] sm:$0x3] }
 0x30a   :  { %1880 = vmatpush1.bf16.msra.mxu1 %v1879_v13  ;;  %v1356_v13 = vld [vmem:[%s2758_s7 + $0x180] sm:$0xff] }
 0x30b   :  { %1882 = vmatprep.subr.bf16.mxu1 %v1881_v14  ;;  %v1358_v14 = vld [vmem:[%s2758_s7 + $0x190] sm:$0xff] }
 0x30c   :  { %1748 = vmatmul.mubr.msk.f32.vlgmr.msra.gmra.mrb[32].mxu0 %vm787_vm5, %v950_v15  ;;  %v1344_v15 = vld [vmem:[%s2758_s7 + $0x120] sm:$0xff] }
 0x30d   :  { %1750 = vmatprep.mubr.msk.f32.mxu0 %vm787_vm5, %v953_v16  ;;  %v1346_v16 = vld [vmem:[%s2758_s7 + $0x130] sm:$0xff] }
 0x310   :  { %1751 = vmatmul.mubr.msk.f32.gmra.mrb[34].mxu0 %vm787_vm5, %v956_v17  ;;  %v1883_v17 = vpack.c.bf16 %v1346_v16, %v1344_v15 }
 0x311   :  { %1753 = vmatprep.mubr.msk.f32.mxu0 %vm787_vm5, %v959_v18 }
 0x312   :  { %1884 = vmatpush1.bf16.msra.mxu1 %v1883_v17  ;;  %v1895_v17 = vpack.c.bf16 %v1358_v14, %v1356_v13 }
 0x313   :  { %1886 = vmatprep.subr.bf16.mxu1 %v1885_v48  ;;  %v1370_v48 = vld [vmem:[%s2758_s7 + $0x1f0] sm:$0xff] }
 0x314   :  { %1754 = vmatmul.mubr.msk.f32.gmra.mrb[36].mxu0 %vm787_vm5, %v962_v19 }
 0x315   :  { %1756 = vmatprep.mubr.msk.f32.mxu0 %vm787_vm5, %v965_v20 }
 0x316   :  { %1888 = vmatpush1.bf16.msra.mxu1 %v1887_v53 }
 0x317   :  { %1890 = vmatprep.subr.bf16.mxu1 %v1889_v61 }
 0x318   :  { %1757 = vmatmul.mubr.msk.f32.gmra.mrb[38].mxu0 %vm787_vm5, %v968_v21 }
 0x31a   :  { %1892 = vmatpush1.bf16.msra.mxu1 %v1891_v2 }
 0x31b   :  { %1894 = vmatprep.subr.bf16.mxu1 %v1893_v11 }
 0x31e   :  { %1896 = vmatpush1.bf16.msra.mxu1 %v1895_v17 }
 0x3b3   :  { %v1657_v18 = vpop.f32.mrb[16].mxu0 }
 0x3b4   :  { %v1658_v19 = vpop.f32.mrb[17].mxu0 }
 0x3b5   :  { %v1659_v20 = vadd.f32 %v1658_v19, %v1657_v18 }
 0x3b7   :  { %v1660_v21 = vpop.f32.mrb[18].mxu0  ;;  %v1107_v47 = vadd.f32 %v1659_v20, %v1595_v41 }
 0x3b8   :  { %v1661_v22 = vpop.f32.mrb[19].mxu0 }
 0x3b9   :  { %v1662_v23 = vadd.f32 %v1661_v22, %v1660_v21  ;;  %v1361_v21 = vld [vmem:[%s2758_s7 + $0x1a8] sm:$0xff]  ;;  %v1363_v22 = vld [vmem:[%s2758_s7 + $0x1b8] sm:$0xff] }
 0x3bb   :  { %v1112_v43 = vadd.f32 %v1662_v23, %v1595_v41 }
 0x3bf   :  { %v1663_v24 = vpop.f32.mrb[20].mxu0 }
 0x3c0   :  { %v1664_v25 = vpop.f32.mrb[21].mxu0 }
 0x3c1   :  { %v1665_v26 = vadd.f32 %v1664_v25, %v1663_v24 }
 0x3c3   :  { %v1666_v27 = vpop.f32.mrb[22].mxu0  ;;  %v1117_v60 = vadd.f32 %v1665_v26, %v1595_v41 }
 0x3c4   :  { %v1667_v28 = vpop.f32.mrb[23].mxu0 }
 0x3c5   :  { %v1668_v29 = vadd.f32 %v1667_v28, %v1666_v27  ;;  %v1897_v27 = vpack.c.bf16 %v1363_v22, %v1361_v21  ;;  %v1360_v28 = vld [vmem:[%s2758_s7 + $0x1a0] sm:$0xff] }
 0x3c7   :  { %v1122_v56 = vadd.f32 %v1668_v29, %v1595_v41  ;;  %v1362_v29 = vld [vmem:[%s2758_s7 + $0x1b0] sm:$0xff]  ;;  %1898 = vmatprep.subr.bf16.mxu1 %v1897_v27 }
 0x3cb   :  { %v1669_v30 = vpop.f32.mrb[24].mxu0 }
 0x3cc   :  { %v1670_v31 = vpop.f32.mrb[25].mxu0 }
 0x3cd   :  { %v1671_v32 = vadd.f32 %v1670_v31, %v1669_v30 }
 0x3cf   :  { %v1672_v33 = vpop.f32.mrb[26].mxu0  ;;  %v1127_v10 = vadd.f32 %v1671_v32, %v1595_v41 }
 0x3d0   :  { %v1673_v34 = vpop.f32.mrb[27].mxu0 }
 0x3d1   :  { %v1674_v35 = vadd.f32 %v1673_v34, %v1672_v33  ;;  %v1899_v33 = vpack.c.bf16 %v1362_v29, %v1360_v28 }
 0x3d3   :  { %v1132_v5 = vadd.f32 %v1674_v35, %v1595_v41  ;;  %1900 = vmatpush1.bf16.msra.mxu1 %v1899_v33 }
 0x3d7   :  { %v1675_v36 = vpop.f32.mrb[28].mxu0 }
 0x3d8   :  { %v1676_v37 = vpop.f32.mrb[29].mxu0 }
 0x3d9   :  { %v1677_v38 = vadd.f32 %v1676_v37, %v1675_v36  ;;  %v1365_v36 = vld [vmem:[%s2758_s7 + $0x1c8] sm:$0xff]  ;;  %v1367_v37 = vld [vmem:[%s2758_s7 + $0x1d8] sm:$0xff] }
 0x3db   :  { %v1678_v12 = vpop.f32.mrb[30].mxu0  ;;  %v1137_v25 = vadd.f32 %v1677_v38, %v1595_v41 }
 0x3dc   :  { %v1679_v39 = vpop.f32.mrb[31].mxu0 }
 0x3dd   :  { %v1680_v42 = vadd.f32 %v1679_v39, %v1678_v12  ;;  %v1901_v12 = vpack.c.bf16 %v1367_v37, %v1365_v36  ;;  %v1364_v39 = vld [vmem:[%s2758_s7 + $0x1c0] sm:$0xff] }
 0x3df   :  { %v1749_v46 = vpop.f32.mrb[32].mxu0  ;;  %v1142_v20 = vadd.f32 %v1680_v42, %v1595_v41  ;;  %v1366_v41 = vld [vmem:[%s2758_s7 + $0x1d0] sm:$0xff]  ;;  %1902 = vmatprep.subr.bf16.mxu1 %v1901_v12 }
 0x3e0   :  { %v1217_v51 = vadd.f32 %v1749_v46, %v1112_v43  ;;  %v1211_v52 = vpop.f32.mrb[33].mxu0  ;;  %v1903_v43 = vpack.c.bf16 %v1366_v41, %v1364_v39  ;;  %v1905_v46 = vpack.c.bf16 %v1371_v45, %v1369_v44 }
 0x3e1   :  { %v1212_v54 = vadd.f32 %v1211_v52, %v1107_v47  ;;  %v1368_v47 = vld [vmem:[%s2758_s7 + $0x1e0] sm:$0xff] }
 0x3e2   :  { %v1251_v55 = vmax.f32 %v1217_v51, 0.0  ;;  %1904 = vmatpush1.bf16.msra.mxu1 %v1903_v43  ;;  %v1907_v49 = vpack.c.bf16 %v1370_v48, %v1368_v47 }
 0x3e3   :  { %v1250_v58 = vmax.f32 %v1212_v54, 0.0  ;;  %v1752_v59 = vpop.f32.mrb[34].mxu0  ;;  %1906 = vmatprep.subr.bf16.mxu1 %v1905_v46 }
 0x3e4   :  { %1259 = vst.msk [vmem:[#allocation6 + $0x8] sm:$0xff] %vm279_vm1, %v1251_v55  ;;  %v1227_v0 = vadd.f32 %v1752_v59, %v1122_v56  ;;  %v1221_v1 = vpop.f32.mrb[35].mxu0 }
 0x3e5   :  { %1258 = vst.msk [vmem:[#allocation6] sm:$0xff] %vm279_vm1, %v1250_v58  ;;  %v1222_v3 = vadd.f32 %v1221_v1, %v1117_v60  ;;  %v1457_v1 = vld [vmem:[%s2760_s9] sm:$0x3]  ;;  %s1945_s9 = smov [#allocation9]  }
 0x3e6   :  { %v1253_v4 = vmax.f32 %v1227_v0, 0.0  ;;  %1908 = vmatpush1.bf16.msra.mxu1 %v1907_v49  ;;  %v1380_v0 = vsub.s32 1, %v1375_v63  ;;  %s1557_s24 = sshll.u32 %s1945_s9, 4  ;;  %s1558_s24 = int_to_ptr.vmem [resolvable:$true] %s1557_s24 }
 0x3e7   :  { %v1252_v8 = vmax.f32 %v1222_v3, 0.0  ;;  %v1755_v9 = vpop.f32.mrb[36].mxu0  ;;  %v1458_v3 = vld [vmem:[#allocation8] sm:$0x1]  ;;  %s1916_s8 = scalar_lea.vmem %s1558_s24, 16  ;;  %s1920_s25 = scalar_lea.vmem %s1558_s24, 32 }
 0x3e8   :  { %1261 = vst.msk [vmem:[#allocation6 + $0x18] sm:$0xff] %vm279_vm1, %v1253_v4  ;;  %v1237_v15 = vadd.f32 %v1755_v9, %v1132_v5  ;;  %v1231_v16 = vpop.f32.mrb[37].mxu0  ;;  %v1476_v2 = vrot.slane %v1457_v1, %v1380_v0  ;;  %v1944_v4 = vmov 0   ;;  %v1376_v5 = vsub.s32 0, %v1375_v63  ;;  %p1917_p0 = scmp.ne.s32.totalorder %s1558_s24, %s1916_s8  ;;  %p1921_p1 = scmp.lt.s32.totalorder %s1558_s24, %s1558_s24 }
 0x3e9   :  { %1260 = vst.msk [vmem:[#allocation6 + $0x10] sm:$0xff] %vm279_vm1, %v1252_v8  ;;  %v1232_v18 = vadd.f32 %v1231_v16, %v1127_v10  ;;  %1915 = vset.pattern.permute.xlu0 %v1944_v4  ;;  %v1381_v8 = vrot.slane %v1372_v6, %v1380_v0  ;;  %p1922_p2 = scmp.lt.s32.totalorder %s1920_s25, %s1916_s8 }
 0x3ea   :  { %v1255_v19 = vmax.f32 %v1237_v15, 0.0  ;;  %1543 = vmatprep.mubr.f32.mxu0 %v1476_v2  ;;  %v1377_v7 = vrot.slane %v1372_v6, %v1376_v5  ;;  %v1472_v16 = vrot.slane %v1457_v1, %v1376_v5 }
 0x3eb   :  { %v1254_v23 = vmax.f32 %v1232_v18, 0.0  ;;  %v1758_v24 = vpop.f32.mrb[38].mxu0  ;;  %v1268_v26 = vld [vmem:[#allocation6 + $0x8] sm:$0xff]  ;;  %p1923_p3 = por %p1922_p2, %p1921_p1 }
 0x3ec   :  { %1263 = vst.msk [vmem:[#allocation6 + $0x28] sm:$0xff] %vm279_vm1, %v1255_v19  ;;  %v1247_v30 = vadd.f32 %v1758_v24, %v1142_v20  ;;  %v1241_v31 = vpop.f32.mrb[39].mxu0  ;;  %1270 = vrot.lane.b32.xlu1 %v1268_v26, %s1941_s13  ;;  %v1266_v32 = vld [vmem:[#allocation6] sm:$0xff] }
 0x3ed   :  { %1262 = vst.msk [vmem:[#allocation6 + $0x20] sm:$0xff] %vm279_vm1, %v1254_v23  ;;  %v1242_v34 = vadd.f32 %v1241_v31, %v1137_v25  ;;  %1267 = vst.msk [vmem:[#allocation7] sm:$0xff] %vm279_vm1, %v1266_v32  ;;  %p1924_p4 = pnand %p1923_p3, %p1917_p0 }
 0x3ee   :  { %v1257_v35 = vmax.f32 %v1247_v30, 0.0 }
 0x3ef   :  { %v1256_v38 = vmax.f32 %v1242_v34, 0.0  ;;  %v1280_v51 = vld [vmem:[#allocation6 + $0x18] sm:$0xff] }
 0x3f0   :  { %1265 = vst.msk [vmem:[#allocation6 + $0x38] sm:$0xff] %vm279_vm1, %v1257_v35  ;;  %v1274_v42 = vld [vmem:[#allocation6 + $0x10] sm:$0xff] }
 0x3f1   :  { %1264 = vst.msk [vmem:[#allocation6 + $0x30] sm:$0xff] %vm279_vm1, %v1256_v38  ;;  %1276 = vrot.lane.b32.xlu1 %v1274_v42, %s1943_s18 }
 0x3f3   :  { %v1288_v50 = vld [vmem:[#allocation6 + $0x28] sm:$0xff] }
 0x3f4   :  { %1290 = vrot.lane.b32.xlu0 %v1288_v50, %s1941_s13  ;;  %v1286_v52 = vld [vmem:[#allocation6 + $0x20] sm:$0xff] }
 0x3f5   :  { %1282 = vrot.lane.b32.xlu1 %v1280_v51, %s1942_s17  ;;  %1287 = vst.msk [vmem:[#allocation7 + $0x8] sm:$0xff] %vm279_vm1, %v1286_v52 }
 0x3f7   :  { %v1300_v54 = vld [vmem:[#allocation6 + $0x38] sm:$0xff] }
 0x3f8   :  { %v1294_v53 = vld [vmem:[#allocation6 + $0x30] sm:$0xff] }
 0x3f9   :  { %1296 = vrot.lane.b32.xlu0 %v1294_v53, %s1943_s18 }
 0x3fd   :  { %1302 = vrot.lane.b32.xlu0 %v1300_v54, %s1942_s17 }
 0x401   :  { %1461 = vperm.xlu0 %1915, %v1458_v3  }
 0x45e   :  { %v1271_v55 = vpop.permute.xlu1 %1270 }
 0x45f   :  { %1273 = vst.msk [vmem:[#allocation7] sm:$0xff] %vm380_vm2, %v1271_v55 }
 0x463   :  { %v1277_v56 = vpop.permute.xlu1 %1276 }
 0x464   :  { %1279 = vst.msk [vmem:[#allocation7] sm:$0xff] %vm453_vm3, %v1277_v56 }
 0x466   :  { %v1291_v40 = vpop.permute.xlu0 %1290 }
 0x467   :  { %1293 = vst.msk [vmem:[#allocation7 + $0x8] sm:$0xff] %vm380_vm2, %v1291_v40  ;;  %v1283_v57 = vpop.permute.xlu1 %1282 }
 0x468   :  { %1285 = vst.msk [vmem:[#allocation7] sm:$0xff] %vm526_vm4, %v1283_v57 }
 0x46b   :  { %v1297_v58 = vpop.permute.xlu0 %1296 }
 0x46c   :  { %1299 = vst.msk [vmem:[#allocation7 + $0x8] sm:$0xff] %vm453_vm3, %v1297_v58 }
 0x46f   :  { %v1303_v59 = vpop.permute.xlu0 %1302  ;;  %v1306_v61 = vld [vmem:[#allocation7] sm:$0xff] }
 0x470   :  { %1305 = vst.msk [vmem:[#allocation7 + $0x8] sm:$0xff] %vm526_vm4, %v1303_v59 }
 0x477   :  { %v1307_v60 = vld [vmem:[#allocation7 + $0x8] sm:$0xff] }
 0x478   :  { %1448 = vmatprep.mubr.f32.mxu1 %v1307_v60 }
 0x479   :  { %1449 = vmatmul.mubr.f32.vlgmr.msra.gmra.mrb[24].mxu1 %v1306_v61 }
 0x480   :  { %v1462_v17 = vpop.permute.xlu0 %1461 }
 0x481   :  { %v1467_v18 = vrot.slane %v1462_v17, %v1376_v5 }
 0x54c   :  { %v1450_v9 = vpop.f32.mrb[24].mxu1 }
 0x54d   :  { %v1451_v10 = vadd.f32 %v1450_v9, %v1377_v7  ;;  %v1452_v11 = vpop.f32.mrb[25].mxu1 }
 0x54e   :  { %v1453_v13 = vadd.f32 %v1452_v11, %v1381_v8 }
 0x54f   :  { %v1455_v15 = vmax.f32 %v1451_v10, 0.0 }
 0x550   :  { %v1456_v14 = vmax.f32 %v1453_v13, 0.0 }
 0x552   :  { %1479 = vmatprep.subr.mxu0 %v1456_v14 }
 0x553   :  { %1480 = vmatpush1.xpose.msra.mxu0 %v1455_v15 }
 0x556   :  { %1544 = vmatmul.mubr.f32.vlgmr.msra.gmra.mrb[40].mxu0 %v1472_v16 }
 0x629   :  { %v1545_v19 = vpop.f32.mrb[40].mxu0 }
 0x62a   :  { %v1546_v20 = vadd.f32 %v1545_v19, %v1467_v18  ;;  %v1547_v21 = vpop.f32.mrb[41].mxu0 }
 0x62c   :  { %1550 = vst.msk [vmem:[#allocation9] sm:$0x1] %vm1549_vm7, %v1546_v20 }
 0x62d   :  { %1927 = shalt.err (!%p1924_p4)
}
 0x62e   :  { %s1928_s10 = scalar_lea.hbm %s2762_s11, 16 }
 0x62f   :  { %p1929_p5 = scmp.ne.s32.totalorder %s2762_s11, %s1928_s10  ;;  %p1932_p6 = scmp.lt.u32.totalorder %s1928_s10, %s2762_s11 }
 0x631   :  { %p1934_p7 = pnand %p1932_p6, %p1929_p5 }
 0x633   :  { %1937 = shalt.err (!%p1934_p7)
}
 0x634   :  { %1560 = dma.vmem_to_hbm [thread:$0]  %s1558_s24, 16, %s2762_s11, [#allocation10]  }
 0x635   :  { %1938 = dma.done.wait [#allocation10], 16  }
 0x636   :  { %1939 = vsyncadd [#allocation10], 4294967280 }
 0x637   :  { %1564 = vsyncpa [#allocation10], 1 }

</bundles_post_ra>
